<compile_context>
chip_gen: v7x
topology: tpu7x:2x2x1
jax: 0.10.0
libtpu: 0.0.40
codegen_flags: <defaults>
</compile_context>

<pallas_src>
import numpy as np
import jax
import jax.numpy as jnp
from jax import lax
from jax.experimental import pallas as pl
from jax.experimental.pallas import tpu as pltpu

HIDDEN = 32
SEQ = 8
NUM_LAYERS = 3
INPUT_SIZE = 2
BATCH = 1

K_DIM = (NUM_LAYERS + 1) * HIDDEN        # 128: [x | h0 | h1 | h2]
N_DIM = 4 * K_DIM                        # 512: [i | f | g | o] groups of 128


def lstm_kernel(x_ref, w_ref, b_ref, wres_ref, bres_ref, out_ref, hist_ref):
    """Fused wavefront LSTM.

    x_ref    : (S, 128)   layer-0 input in lanes 0:INPUT_SIZE, zeros elsewhere
    w_ref    : (128, 512) fused block-diagonal weights (gate-major columns)
    b_ref    : (1, 512)   fused biases (b_ih + b_hh), g-group pre-scaled by 2
    wres_ref : (1, 128)   final linear weight on the h2 lanes (96:128), else 0
    bres_ref : (1, 1)     final linear bias
    out_ref  : (S, 1)     sigmoid(linear(h_layer2))
    hist_ref : (S, 128)   scratch: state vector after each layer-2 step
    """
    H = HIDDEN
    S = SEQ
    L = NUM_LAYERS

    c = jnp.zeros((1, K_DIM), jnp.float32)   # [pad | c0 | c1 | c2], pad stays 0
    h = jnp.zeros((1, K_DIM), jnp.float32)   # [pad | h0 | h1 | h2], pad stays 0
    b = b_ref[...]

    for k in range(S + L - 1):               # fully unrolled: 10 slots
        if k < S:
            v = x_ref[pl.ds(k, 1), :] + h    # x lanes and h lanes are disjoint
        else:
            v = h                            # layer 0 inactive; x irrelevant

        gates = jnp.dot(v, w_ref[...],
                        preferred_element_type=jnp.float32) + b   # (1, 512)
        a = jax.nn.sigmoid(gates)            # one full-width EUP pass
        i_all = a[:, 0 * K_DIM:1 * K_DIM]
        f_all = a[:, 1 * K_DIM:2 * K_DIM]
        g_all = 2.0 * a[:, 2 * K_DIM:3 * K_DIM] - 1.0   # tanh via scaled sigmoid
        o_all = a[:, 3 * K_DIM:4 * K_DIM]

        c_new = f_all * c + i_all * g_all

        # Layer l is active at slot k iff l <= k < S + l (static per slot).
        l_lo = max(0, k - S + 1)
        l_hi = min(L - 1, k)
        if l_lo == 0 and l_hi == L - 1:
            c = c_new
            h = o_all * jnp.tanh(c)
        else:
            lane = lax.broadcasted_iota(jnp.int32, (1, K_DIM), 1)
            mask = (lane >= (l_lo + 1) * H) & (lane < (l_hi + 2) * H)
            c = jnp.where(mask, c_new, c)
            h = jnp.where(mask, o_all * jnp.tanh(c), h)

        # Layer 2 produced output for time t = k - 2: record the state row.
        if k >= L - 1:
            hist_ref[pl.ds(k - (L - 1), 1), :] = h

    # Final Linear(H,1) + Sigmoid: VPU multiply + lane reduction (wres is zero
    # outside the h2 lanes, so h0/h1 columns contribute nothing).
    y = jnp.sum(hist_ref[...] * wres_ref[...], axis=1, keepdims=True) + bres_ref[...]
    out_ref[...] = jax.nn.sigmoid(y)


def init_params(key, hidden=HIDDEN, input_size=INPUT_SIZE, num_layers=NUM_LAYERS):
    """Deterministic init matching PyTorch nn.LSTM/Linear shapes (+-1/sqrt(H))."""
    k = 1.0 / np.sqrt(hidden)
    layers = []
    keys = jax.random.split(key, num_layers * 4 + 2)
    ki = 0
    for l in range(num_layers):
        in_sz = input_size if l == 0 else hidden
        w_ih = jax.random.uniform(keys[ki], (4 * hidden, in_sz),
                                  minval=-k, maxval=k, dtype=jnp.float32); ki += 1
        w_hh = jax.random.uniform(keys[ki], (4 * hidden, hidden),
                                  minval=-k, maxval=k, dtype=jnp.float32); ki += 1
        b_ih = jax.random.uniform(keys[ki], (4 * hidden,),
                                  minval=-k, maxval=k, dtype=jnp.float32); ki += 1
        b_hh = jax.random.uniform(keys[ki], (4 * hidden,),
                                  minval=-k, maxval=k, dtype=jnp.float32); ki += 1
        layers.append((w_ih, w_hh, b_ih, b_hh))
    w_res = jax.random.uniform(keys[ki], (1, hidden),
                               minval=-k, maxval=k, dtype=jnp.float32); ki += 1
    b_res = jax.random.uniform(keys[ki], (1,),
                               minval=-k, maxval=k, dtype=jnp.float32)
    return layers, w_res, b_res


def pack_params(layers, w_res, b_res, hidden=HIDDEN):
    """Build the fused wavefront weight/bias and the padded output weight."""
    H = hidden
    L = len(layers)
    w = np.zeros((K_DIM, N_DIM), np.float32)
    b = np.zeros((1, N_DIM), np.float32)
    for l, (w_ih, w_hh, b_ih, b_hh) in enumerate(layers):
        w_ih = np.asarray(w_ih, np.float32)
        w_hh = np.asarray(w_hh, np.float32)
        b_l = np.asarray(b_ih, np.float32) + np.asarray(b_hh, np.float32)
        in_sz = w_ih.shape[1]
        # input rows: x segment (lanes 0:H) for layer 0, h_{l-1} segment otherwise
        in_rows = slice(l * H, l * H + in_sz)
        # recurrent rows: this layer's own h segment
        hh_rows = slice((l + 1) * H, (l + 2) * H)
        for q in range(4):                      # PyTorch gate order i, f, g, o
            cols = slice(q * K_DIM + (l + 1) * H, q * K_DIM + (l + 2) * H)
            w[in_rows, cols] = w_ih[q * H:(q + 1) * H, :].T
            w[hh_rows, cols] = w_hh[q * H:(q + 1) * H, :].T
            b[0, cols] = b_l[q * H:(q + 1) * H]
    # tanh(x) = 2*sigmoid(2x) - 1: pre-scale the g-gate group by 2
    gcols = slice(2 * K_DIM, 3 * K_DIM)
    w[:, gcols] *= 2.0
    b[:, gcols] *= 2.0
    wres_row = np.zeros((1, K_DIM), np.float32)
    wres_row[0, L * H:(L + 1) * H] = np.asarray(w_res, np.float32)[0, :]
    bres = np.asarray(b_res, np.float32).reshape(1, 1)
    return (jnp.asarray(w), jnp.asarray(b), jnp.asarray(wres_row),
            jnp.asarray(bres))


def lstm_forward(x, layers, w_res, b_res, hidden=HIDDEN):
    """x: (BATCH=1, S, 2) float32 -> (1, S) float32"""
    assert x.shape[0] == BATCH and x.shape[1] == SEQ
    S = x.shape[1]
    w, b, wres_row, bres = pack_params(layers, w_res, b_res, hidden)
    x_pad = jnp.zeros((S, K_DIM), jnp.float32).at[:, :x.shape[2]].set(x[0])

    out = pl.pallas_call(
        lstm_kernel,
        out_shape=jax.ShapeDtypeStruct((S, 1), jnp.float32),
        in_specs=[pl.BlockSpec(memory_space=pltpu.MemorySpace.VMEM)] * 5,
        out_specs=pl.BlockSpec(memory_space=pltpu.MemorySpace.VMEM),
        scratch_shapes=[pltpu.VMEM((S, K_DIM), jnp.float32)],   # state history
    )(x_pad, w, b, wres_row, bres)
    return out.reshape(BATCH, S)


def lstm_ref(x, layers, w_res, b_res):
    """Pure-JAX reference matching PyTorch nn.LSTM semantics."""
    cur = x[0]
    for (w_ih, w_hh, b_ih, b_hh) in layers:
        H = w_hh.shape[1]
        h = jnp.zeros((H,), jnp.float32)
        c = jnp.zeros((H,), jnp.float32)
        outs = []
        for t in range(cur.shape[0]):
            g = w_ih @ cur[t] + b_ih + w_hh @ h + b_hh
            i_g = jax.nn.sigmoid(g[0:H])
            f_g = jax.nn.sigmoid(g[H:2 * H])
            g_g = jnp.tanh(g[2 * H:3 * H])
            o_g = jax.nn.sigmoid(g[3 * H:4 * H])
            c = f_g * c + i_g * g_g
            h = o_g * jnp.tanh(c)
            outs.append(h)
        cur = jnp.stack(outs)
    y = cur @ w_res.T + b_res
    return jax.nn.sigmoid(y).reshape(1, -1)


if __name__ == "__main__":
    key = jax.random.PRNGKey(0)
    pkey, xkey = jax.random.split(key)
    layers, w_res, b_res = init_params(pkey)
    x = jax.random.normal(xkey, (BATCH, SEQ, INPUT_SIZE), dtype=jnp.float32)

    y = lstm_forward(x, layers, w_res, b_res)
    y = jax.block_until_ready(y)

    y_ref = jax.block_until_ready(lstm_ref(x, layers, w_res, b_res))
    np.testing.assert_allclose(np.asarray(y), np.asarray(y_ref),
                               rtol=1e-4, atol=1e-4)
    assert y.shape == (BATCH, SEQ)
    print("KERNEL_OK")
</pallas_src>

<mosaic_0001>
module attributes {stable_mosaic.version = 11 : i64} {
  func.func @lstm_kernel(%arg0: memref<8x128xf32, #tpu.memory_space<vmem>>, %arg1: memref<128x512xf32, #tpu.memory_space<vmem>>, %arg2: memref<1x512xf32, #tpu.memory_space<vmem>>, %arg3: memref<1x128xf32, #tpu.memory_space<vmem>>, %arg4: memref<1x1xf32, #tpu.memory_space<vmem>>, %arg5: memref<8x1xf32, #tpu.memory_space<vmem>>, %arg6: memref<8x128xf32, #tpu.memory_space<vmem>>) attributes {dimension_semantics = [], scalar_prefetch = 0 : i64, scratch_operands = 1 : i64, tpu.core_type = #tpu.core_type<tc>} {
    %cst = arith.constant 0.000000e+00 : f32
    %0 = vector.broadcast %cst : f32 to vector<1x128xf32>
    %cst_0 = arith.constant 0.000000e+00 : f32
    %1 = vector.broadcast %cst_0 : f32 to vector<1x128xf32>
    %c0 = arith.constant 0 : index
    %c0_1 = arith.constant 0 : index
    %2 = vector.load %arg2[%c0, %c0_1] : memref<1x512xf32, #tpu.memory_space<vmem>>, vector<1x512xf32>
    %c0_2 = arith.constant 0 : index
    %c0_3 = arith.constant 0 : index
    %3 = vector.load %arg0[%c0_2, %c0_3] : memref<8x128xf32, #tpu.memory_space<vmem>>, vector<1x128xf32>
    %4 = arith.addf %3, %1 : vector<1x128xf32>
    %c0_4 = arith.constant 0 : index
    %c0_5 = arith.constant 0 : index
    %5 = vector.load %arg1[%c0_4, %c0_5] : memref<128x512xf32, #tpu.memory_space<vmem>>, vector<128x512xf32>
    %cst_6 = arith.constant dense<0.000000e+00> : vector<1x512xf32>
    %6 = tpu.matmul %4, %5, %cst_6 {dimension_numbers = #tpu.dot_dimension_numbers<[1], [0], [0], [1], [0, 0, 1, 1], [], []>} : vector<1x128xf32>, vector<128x512xf32>, vector<1x512xf32> -> vector<1x512xf32>
    %7 = arith.addf %6, %2 : vector<1x512xf32>
    %8 = arith.negf %7 : vector<1x512xf32>
    %9 = math.exp %8 : vector<1x512xf32>
    %cst_7 = arith.constant 1.000000e+00 : f32
    %10 = vector.broadcast %cst_7 : f32 to vector<1x512xf32>
    %11 = arith.addf %10, %9 : vector<1x512xf32>
    %12 = arith.divf %10, %11 : vector<1x512xf32>
    %13 = vector.extract_strided_slice %12 {offsets = [0, 0], sizes = [1, 128], strides = [1, 1]} : vector<1x512xf32> to vector<1x128xf32>
    %14 = vector.extract_strided_slice %12 {offsets = [0, 128], sizes = [1, 128], strides = [1, 1]} : vector<1x512xf32> to vector<1x128xf32>
    %15 = vector.extract_strided_slice %12 {offsets = [0, 256], sizes = [1, 128], strides = [1, 1]} : vector<1x512xf32> to vector<1x128xf32>
    %cst_8 = arith.constant 2.000000e+00 : f32
    %16 = vector.broadcast %cst_8 : f32 to vector<1x128xf32>
    %17 = arith.mulf %16, %15 : vector<1x128xf32>
    %cst_9 = arith.constant 1.000000e+00 : f32
    %18 = vector.broadcast %cst_9 : f32 to vector<1x128xf32>
    %19 = arith.subf %17, %18 : vector<1x128xf32>
    %20 = vector.extract_strided_slice %12 {offsets = [0, 384], sizes = [1, 128], strides = [1, 1]} : vector<1x512xf32> to vector<1x128xf32>
    %21 = arith.mulf %14, %0 : vector<1x128xf32>
    %22 = arith.mulf %13, %19 : vector<1x128xf32>
    %23 = arith.addf %21, %22 : vector<1x128xf32>
    %24 = tpu.iota {dimensions = array<i32: 1>} : vector<1x128xi32>
    %c32_i32 = arith.constant 32 : i32
    %25 = vector.broadcast %c32_i32 : i32 to vector<1x128xi32>
    %26 = arith.cmpi sge, %24, %25 : vector<1x128xi32>
    %c64_i32 = arith.constant 64 : i32
    %27 = vector.broadcast %c64_i32 : i32 to vector<1x128xi32>
    %28 = arith.cmpi slt, %24, %27 : vector<1x128xi32>
    %29 = arith.andi %26, %28 : vector<1x128xi1>
    %30 = arith.select %29, %23, %0 : vector<1x128xi1>, vector<1x128xf32>
    %31 = math.tanh %30 : vector<1x128xf32>
    %32 = arith.mulf %20, %31 : vector<1x128xf32>
    %33 = arith.select %29, %32, %1 : vector<1x128xi1>, vector<1x128xf32>
    %c1 = arith.constant 1 : index
    %c0_10 = arith.constant 0 : index
    %34 = vector.load %arg0[%c1, %c0_10] : memref<8x128xf32, #tpu.memory_space<vmem>>, vector<1x128xf32>
    %35 = arith.addf %34, %33 : vector<1x128xf32>
    %c0_11 = arith.constant 0 : index
    %c0_12 = arith.constant 0 : index
    %36 = vector.load %arg1[%c0_11, %c0_12] : memref<128x512xf32, #tpu.memory_space<vmem>>, vector<128x512xf32>
    %cst_13 = arith.constant dense<0.000000e+00> : vector<1x512xf32>
    %37 = tpu.matmul %35, %36, %cst_13 {dimension_numbers = #tpu.dot_dimension_numbers<[1], [0], [0], [1], [0, 0, 1, 1], [], []>} : vector<1x128xf32>, vector<128x512xf32>, vector<1x512xf32> -> vector<1x512xf32>
    %38 = arith.addf %37, %2 : vector<1x512xf32>
    %39 = arith.negf %38 : vector<1x512xf32>
    %40 = math.exp %39 : vector<1x512xf32>
    %cst_14 = arith.constant 1.000000e+00 : f32
    %41 = vector.broadcast %cst_14 : f32 to vector<1x512xf32>
    %42 = arith.addf %41, %40 : vector<1x512xf32>
    %43 = arith.divf %41, %42 : vector<1x512xf32>
    %44 = vector.extract_strided_slice %43 {offsets = [0, 0], sizes = [1, 128], strides = [1, 1]} : vector<1x512xf32> to vector<1x128xf32>
    %45 = vector.extract_strided_slice %43 {offsets = [0, 128], sizes = [1, 128], strides = [1, 1]} : vector<1x512xf32> to vector<1x128xf32>
    %46 = vector.extract_strided_slice %43 {offsets = [0, 256], sizes = [1, 128], strides = [1, 1]} : vector<1x512xf32> to vector<1x128xf32>
    %cst_15 = arith.constant 2.000000e+00 : f32
    %47 = vector.broadcast %cst_15 : f32 to vector<1x128xf32>
    %48 = arith.mulf %47, %46 : vector<1x128xf32>
    %cst_16 = arith.constant 1.000000e+00 : f32
    %49 = vector.broadcast %cst_16 : f32 to vector<1x128xf32>
    %50 = arith.subf %48, %49 : vector<1x128xf32>
    %51 = vector.extract_strided_slice %43 {offsets = [0, 384], sizes = [1, 128], strides = [1, 1]} : vector<1x512xf32> to vector<1x128xf32>
    %52 = arith.mulf %45, %30 : vector<1x128xf32>
    %53 = arith.mulf %44, %50 : vector<1x128xf32>
    %54 = arith.addf %52, %53 : vector<1x128xf32>
    %55 = tpu.iota {dimensions = array<i32: 1>} : vector<1x128xi32>
    %c32_i32_17 = arith.constant 32 : i32
    %56 = vector.broadcast %c32_i32_17 : i32 to vector<1x128xi32>
    %57 = arith.cmpi sge, %55, %56 : vector<1x128xi32>
    %c96_i32 = arith.constant 96 : i32
    %58 = vector.broadcast %c96_i32 : i32 to vector<1x128xi32>
    %59 = arith.cmpi slt, %55, %58 : vector<1x128xi32>
    %60 = arith.andi %57, %59 : vector<1x128xi1>
    %61 = arith.select %60, %54, %30 : vector<1x128xi1>, vector<1x128xf32>
    %62 = math.tanh %61 : vector<1x128xf32>
    %63 = arith.mulf %51, %62 : vector<1x128xf32>
    %64 = arith.select %60, %63, %33 : vector<1x128xi1>, vector<1x128xf32>
    %c2 = arith.constant 2 : index
    %c0_18 = arith.constant 0 : index
    %65 = vector.load %arg0[%c2, %c0_18] : memref<8x128xf32, #tpu.memory_space<vmem>>, vector<1x128xf32>
    %66 = arith.addf %65, %64 : vector<1x128xf32>
    %c0_19 = arith.constant 0 : index
    %c0_20 = arith.constant 0 : index
    %67 = vector.load %arg1[%c0_19, %c0_20] : memref<128x512xf32, #tpu.memory_space<vmem>>, vector<128x512xf32>
    %cst_21 = arith.constant dense<0.000000e+00> : vector<1x512xf32>
    %68 = tpu.matmul %66, %67, %cst_21 {dimension_numbers = #tpu.dot_dimension_numbers<[1], [0], [0], [1], [0, 0, 1, 1], [], []>} : vector<1x128xf32>, vector<128x512xf32>, vector<1x512xf32> -> vector<1x512xf32>
    %69 = arith.addf %68, %2 : vector<1x512xf32>
    %70 = arith.negf %69 : vector<1x512xf32>
    %71 = math.exp %70 : vector<1x512xf32>
    %cst_22 = arith.constant 1.000000e+00 : f32
    %72 = vector.broadcast %cst_22 : f32 to vector<1x512xf32>
    %73 = arith.addf %72, %71 : vector<1x512xf32>
    %74 = arith.divf %72, %73 : vector<1x512xf32>
    %75 = vector.extract_strided_slice %74 {offsets = [0, 0], sizes = [1, 128], strides = [1, 1]} : vector<1x512xf32> to vector<1x128xf32>
    %76 = vector.extract_strided_slice %74 {offsets = [0, 128], sizes = [1, 128], strides = [1, 1]} : vector<1x512xf32> to vector<1x128xf32>
    %77 = vector.extract_strided_slice %74 {offsets = [0, 256], sizes = [1, 128], strides = [1, 1]} : vector<1x512xf32> to vector<1x128xf32>
    %cst_23 = arith.constant 2.000000e+00 : f32
    %78 = vector.broadcast %cst_23 : f32 to vector<1x128xf32>
    %79 = arith.mulf %78, %77 : vector<1x128xf32>
    %cst_24 = arith.constant 1.000000e+00 : f32
    %80 = vector.broadcast %cst_24 : f32 to vector<1x128xf32>
    %81 = arith.subf %79, %80 : vector<1x128xf32>
    %82 = vector.extract_strided_slice %74 {offsets = [0, 384], sizes = [1, 128], strides = [1, 1]} : vector<1x512xf32> to vector<1x128xf32>
    %83 = arith.mulf %76, %61 : vector<1x128xf32>
    %84 = arith.mulf %75, %81 : vector<1x128xf32>
    %85 = arith.addf %83, %84 : vector<1x128xf32>
    %86 = math.tanh %85 : vector<1x128xf32>
    %87 = arith.mulf %82, %86 : vector<1x128xf32>
    %c0_25 = arith.constant 0 : index
    %c0_26 = arith.constant 0 : index
    %88 = vector.load %arg6[%c0_25, %c0_26] : memref<8x128xf32, #tpu.memory_space<vmem>>, vector<1x128xf32>
    tpu.vector_store %arg6[%c0_25, %c0_26], %87 {strides = array<i32>} : memref<8x128xf32, #tpu.memory_space<vmem>>, vector<1x128xf32>,
    %c3 = arith.constant 3 : index
    %c0_27 = arith.constant 0 : index
    %89 = vector.load %arg0[%c3, %c0_27] : memref<8x128xf32, #tpu.memory_space<vmem>>, vector<1x128xf32>
    %90 = arith.addf %89, %87 : vector<1x128xf32>
    %c0_28 = arith.constant 0 : index
    %c0_29 = arith.constant 0 : index
    %91 = vector.load %arg1[%c0_28, %c0_29] : memref<128x512xf32, #tpu.memory_space<vmem>>, vector<128x512xf32>
    %cst_30 = arith.constant dense<0.000000e+00> : vector<1x512xf32>
    %92 = tpu.matmul %90, %91, %cst_30 {dimension_numbers = #tpu.dot_dimension_numbers<[1], [0], [0], [1], [0, 0, 1, 1], [], []>} : vector<1x128xf32>, vector<128x512xf32>, vector<1x512xf32> -> vector<1x512xf32>
    %93 = arith.addf %92, %2 : vector<1x512xf32>
    %94 = arith.negf %93 : vector<1x512xf32>
    %95 = math.exp %94 : vector<1x512xf32>
    %cst_31 = arith.constant 1.000000e+00 : f32
    %96 = vector.broadcast %cst_31 : f32 to vector<1x512xf32>
    %97 = arith.addf %96, %95 : vector<1x512xf32>
    %98 = arith.divf %96, %97 : vector<1x512xf32>
    %99 = vector.extract_strided_slice %98 {offsets = [0, 0], sizes = [1, 128], strides = [1, 1]} : vector<1x512xf32> to vector<1x128xf32>
    %100 = vector.extract_strided_slice %98 {offsets = [0, 128], sizes = [1, 128], strides = [1, 1]} : vector<1x512xf32> to vector<1x128xf32>
    %101 = vector.extract_strided_slice %98 {offsets = [0, 256], sizes = [1, 128], strides = [1, 1]} : vector<1x512xf32> to vector<1x128xf32>
    %cst_32 = arith.constant 2.000000e+00 : f32
    %102 = vector.broadcast %cst_32 : f32 to vector<1x128xf32>
    %103 = arith.mulf %102, %101 : vector<1x128xf32>
    %cst_33 = arith.constant 1.000000e+00 : f32
    %104 = vector.broadcast %cst_33 : f32 to vector<1x128xf32>
    %105 = arith.subf %103, %104 : vector<1x128xf32>
    %106 = vector.extract_strided_slice %98 {offsets = [0, 384], sizes = [1, 128], strides = [1, 1]} : vector<1x512xf32> to vector<1x128xf32>
    %107 = arith.mulf %100, %85 : vector<1x128xf32>
    %108 = arith.mulf %99, %105 : vector<1x128xf32>
    %109 = arith.addf %107, %108 : vector<1x128xf32>
    %110 = math.tanh %109 : vector<1x128xf32>
    %111 = arith.mulf %106, %110 : vector<1x128xf32>
    %c1_34 = arith.constant 1 : index
    %c0_35 = arith.constant 0 : index
    %112 = vector.load %arg6[%c1_34, %c0_35] : memref<8x128xf32, #tpu.memory_space<vmem>>, vector<1x128xf32>
    tpu.vector_store %arg6[%c1_34, %c0_35], %111 {strides = array<i32>} : memref<8x128xf32, #tpu.memory_space<vmem>>, vector<1x128xf32>,
    %c4 = arith.constant 4 : index
    %c0_36 = arith.constant 0 : index
    %113 = vector.load %arg0[%c4, %c0_36] : memref<8x128xf32, #tpu.memory_space<vmem>>, vector<1x128xf32>
    %114 = arith.addf %113, %111 : vector<1x128xf32>
    %c0_37 = arith.constant 0 : index
    %c0_38 = arith.constant 0 : index
    %115 = vector.load %arg1[%c0_37, %c0_38] : memref<128x512xf32, #tpu.memory_space<vmem>>, vector<128x512xf32>
    %cst_39 = arith.constant dense<0.000000e+00> : vector<1x512xf32>
    %116 = tpu.matmul %114, %115, %cst_39 {dimension_numbers = #tpu.dot_dimension_numbers<[1], [0], [0], [1], [0, 0, 1, 1], [], []>} : vector<1x128xf32>, vector<128x512xf32>, vector<1x512xf32> -> vector<1x512xf32>
    %117 = arith.addf %116, %2 : vector<1x512xf32>
    %118 = arith.negf %117 : vector<1x512xf32>
    %119 = math.exp %118 : vector<1x512xf32>
    %cst_40 = arith.constant 1.000000e+00 : f32
    %120 = vector.broadcast %cst_40 : f32 to vector<1x512xf32>
    %121 = arith.addf %120, %119 : vector<1x512xf32>
    %122 = arith.divf %120, %121 : vector<1x512xf32>
    %123 = vector.extract_strided_slice %122 {offsets = [0, 0], sizes = [1, 128], strides = [1, 1]} : vector<1x512xf32> to vector<1x128xf32>
    %124 = vector.extract_strided_slice %122 {offsets = [0, 128], sizes = [1, 128], strides = [1, 1]} : vector<1x512xf32> to vector<1x128xf32>
    %125 = vector.extract_strided_slice %122 {offsets = [0, 256], sizes = [1, 128], strides = [1, 1]} : vector<1x512xf32> to vector<1x128xf32>
    %cst_41 = arith.constant 2.000000e+00 : f32
    %126 = vector.broadcast %cst_41 : f32 to vector<1x128xf32>
    %127 = arith.mulf %126, %125 : vector<1x128xf32>
    %cst_42 = arith.constant 1.000000e+00 : f32
    %128 = vector.broadcast %cst_42 : f32 to vector<1x128xf32>
    %129 = arith.subf %127, %128 : vector<1x128xf32>
    %130 = vector.extract_strided_slice %122 {offsets = [0, 384], sizes = [1, 128], strides = [1, 1]} : vector<1x512xf32> to vector<1x128xf32>
    %131 = arith.mulf %124, %109 : vector<1x128xf32>
    %132 = arith.mulf %123, %129 : vector<1x128xf32>
    %133 = arith.addf %131, %132 : vector<1x128xf32>
    %134 = math.tanh %133 : vector<1x128xf32>
    %135 = arith.mulf %130, %134 : vector<1x128xf32>
    %c2_43 = arith.constant 2 : index
    %c0_44 = arith.constant 0 : index
    %136 = vector.load %arg6[%c2_43, %c0_44] : memref<8x128xf32, #tpu.memory_space<vmem>>, vector<1x128xf32>
    tpu.vector_store %arg6[%c2_43, %c0_44], %135 {strides = array<i32>} : memref<8x128xf32, #tpu.memory_space<vmem>>, vector<1x128xf32>,
    %c5 = arith.constant 5 : index
    %c0_45 = arith.constant 0 : index
    %137 = vector.load %arg0[%c5, %c0_45] : memref<8x128xf32, #tpu.memory_space<vmem>>, vector<1x128xf32>
    %138 = arith.addf %137, %135 : vector<1x128xf32>
    %c0_46 = arith.constant 0 : index
    %c0_47 = arith.constant 0 : index
    %139 = vector.load %arg1[%c0_46, %c0_47] : memref<128x512xf32, #tpu.memory_space<vmem>>, vector<128x512xf32>
    %cst_48 = arith.constant dense<0.000000e+00> : vector<1x512xf32>
    %140 = tpu.matmul %138, %139, %cst_48 {dimension_numbers = #tpu.dot_dimension_numbers<[1], [0], [0], [1], [0, 0, 1, 1], [], []>} : vector<1x128xf32>, vector<128x512xf32>, vector<1x512xf32> -> vector<1x512xf32>
    %141 = arith.addf %140, %2 : vector<1x512xf32>
    %142 = arith.negf %141 : vector<1x512xf32>
    %143 = math.exp %142 : vector<1x512xf32>
    %cst_49 = arith.constant 1.000000e+00 : f32
    %144 = vector.broadcast %cst_49 : f32 to vector<1x512xf32>
    %145 = arith.addf %144, %143 : vector<1x512xf32>
    %146 = arith.divf %144, %145 : vector<1x512xf32>
    %147 = vector.extract_strided_slice %146 {offsets = [0, 0], sizes = [1, 128], strides = [1, 1]} : vector<1x512xf32> to vector<1x128xf32>
    %148 = vector.extract_strided_slice %146 {offsets = [0, 128], sizes = [1, 128], strides = [1, 1]} : vector<1x512xf32> to vector<1x128xf32>
    %149 = vector.extract_strided_slice %146 {offsets = [0, 256], sizes = [1, 128], strides = [1, 1]} : vector<1x512xf32> to vector<1x128xf32>
    %cst_50 = arith.constant 2.000000e+00 : f32
    %150 = vector.broadcast %cst_50 : f32 to vector<1x128xf32>
    %151 = arith.mulf %150, %149 : vector<1x128xf32>
    %cst_51 = arith.constant 1.000000e+00 : f32
    %152 = vector.broadcast %cst_51 : f32 to vector<1x128xf32>
    %153 = arith.subf %151, %152 : vector<1x128xf32>
    %154 = vector.extract_strided_slice %146 {offsets = [0, 384], sizes = [1, 128], strides = [1, 1]} : vector<1x512xf32> to vector<1x128xf32>
    %155 = arith.mulf %148, %133 : vector<1x128xf32>
    %156 = arith.mulf %147, %153 : vector<1x128xf32>
    %157 = arith.addf %155, %156 : vector<1x128xf32>
    %158 = math.tanh %157 : vector<1x128xf32>
    %159 = arith.mulf %154, %158 : vector<1x128xf32>
    %c3_52 = arith.constant 3 : index
    %c0_53 = arith.constant 0 : index
    %160 = vector.load %arg6[%c3_52, %c0_53] : memref<8x128xf32, #tpu.memory_space<vmem>>, vector<1x128xf32>
    tpu.vector_store %arg6[%c3_52, %c0_53], %159 {strides = array<i32>} : memref<8x128xf32, #tpu.memory_space<vmem>>, vector<1x128xf32>,
    %c6 = arith.constant 6 : index
    %c0_54 = arith.constant 0 : index
    %161 = vector.load %arg0[%c6, %c0_54] : memref<8x128xf32, #tpu.memory_space<vmem>>, vector<1x128xf32>
    %162 = arith.addf %161, %159 : vector<1x128xf32>
    %c0_55 = arith.constant 0 : index
    %c0_56 = arith.constant 0 : index
    %163 = vector.load %arg1[%c0_55, %c0_56] : memref<128x512xf32, #tpu.memory_space<vmem>>, vector<128x512xf32>
    %cst_57 = arith.constant dense<0.000000e+00> : vector<1x512xf32>
    %164 = tpu.matmul %162, %163, %cst_57 {dimension_numbers = #tpu.dot_dimension_numbers<[1], [0], [0], [1], [0, 0, 1, 1], [], []>} : vector<1x128xf32>, vector<128x512xf32>, vector<1x512xf32> -> vector<1x512xf32>
    %165 = arith.addf %164, %2 : vector<1x512xf32>
    %166 = arith.negf %165 : vector<1x512xf32>
    %167 = math.exp %166 : vector<1x512xf32>
    %cst_58 = arith.constant 1.000000e+00 : f32
    %168 = vector.broadcast %cst_58 : f32 to vector<1x512xf32>
    %169 = arith.addf %168, %167 : vector<1x512xf32>
    %170 = arith.divf %168, %169 : vector<1x512xf32>
    %171 = vector.extract_strided_slice %170 {offsets = [0, 0], sizes = [1, 128], strides = [1, 1]} : vector<1x512xf32> to vector<1x128xf32>
    %172 = vector.extract_strided_slice %170 {offsets = [0, 128], sizes = [1, 128], strides = [1, 1]} : vector<1x512xf32> to vector<1x128xf32>
    %173 = vector.extract_strided_slice %170 {offsets = [0, 256], sizes = [1, 128], strides = [1, 1]} : vector<1x512xf32> to vector<1x128xf32>
    %cst_59 = arith.constant 2.000000e+00 : f32
    %174 = vector.broadcast %cst_59 : f32 to vector<1x128xf32>
    %175 = arith.mulf %174, %173 : vector<1x128xf32>
    %cst_60 = arith.constant 1.000000e+00 : f32
    %176 = vector.broadcast %cst_60 : f32 to vector<1x128xf32>
    %177 = arith.subf %175, %176 : vector<1x128xf32>
    %178 = vector.extract_strided_slice %170 {offsets = [0, 384], sizes = [1, 128], strides = [1, 1]} : vector<1x512xf32> to vector<1x128xf32>
    %179 = arith.mulf %172, %157 : vector<1x128xf32>
    %180 = arith.mulf %171, %177 : vector<1x128xf32>
    %181 = arith.addf %179, %180 : vector<1x128xf32>
    %182 = math.tanh %181 : vector<1x128xf32>
    %183 = arith.mulf %178, %182 : vector<1x128xf32>
    %c4_61 = arith.constant 4 : index
    %c0_62 = arith.constant 0 : index
    %184 = vector.load %arg6[%c4_61, %c0_62] : memref<8x128xf32, #tpu.memory_space<vmem>>, vector<1x128xf32>
    tpu.vector_store %arg6[%c4_61, %c0_62], %183 {strides = array<i32>} : memref<8x128xf32, #tpu.memory_space<vmem>>, vector<1x128xf32>,
    %c7 = arith.constant 7 : index
    %c0_63 = arith.constant 0 : index
    %185 = vector.load %arg0[%c7, %c0_63] : memref<8x128xf32, #tpu.memory_space<vmem>>, vector<1x128xf32>
    %186 = arith.addf %185, %183 : vector<1x128xf32>
    %c0_64 = arith.constant 0 : index
    %c0_65 = arith.constant 0 : index
    %187 = vector.load %arg1[%c0_64, %c0_65] : memref<128x512xf32, #tpu.memory_space<vmem>>, vector<128x512xf32>
    %cst_66 = arith.constant dense<0.000000e+00> : vector<1x512xf32>
    %188 = tpu.matmul %186, %187, %cst_66 {dimension_numbers = #tpu.dot_dimension_numbers<[1], [0], [0], [1], [0, 0, 1, 1], [], []>} : vector<1x128xf32>, vector<128x512xf32>, vector<1x512xf32> -> vector<1x512xf32>
    %189 = arith.addf %188, %2 : vector<1x512xf32>
    %190 = arith.negf %189 : vector<1x512xf32>
    %191 = math.exp %190 : vector<1x512xf32>
    %cst_67 = arith.constant 1.000000e+00 : f32
    %192 = vector.broadcast %cst_67 : f32 to vector<1x512xf32>
    %193 = arith.addf %192, %191 : vector<1x512xf32>
    %194 = arith.divf %192, %193 : vector<1x512xf32>
    %195 = vector.extract_strided_slice %194 {offsets = [0, 0], sizes = [1, 128], strides = [1, 1]} : vector<1x512xf32> to vector<1x128xf32>
    %196 = vector.extract_strided_slice %194 {offsets = [0, 128], sizes = [1, 128], strides = [1, 1]} : vector<1x512xf32> to vector<1x128xf32>
    %197 = vector.extract_strided_slice %194 {offsets = [0, 256], sizes = [1, 128], strides = [1, 1]} : vector<1x512xf32> to vector<1x128xf32>
    %cst_68 = arith.constant 2.000000e+00 : f32
    %198 = vector.broadcast %cst_68 : f32 to vector<1x128xf32>
    %199 = arith.mulf %198, %197 : vector<1x128xf32>
    %cst_69 = arith.constant 1.000000e+00 : f32
    %200 = vector.broadcast %cst_69 : f32 to vector<1x128xf32>
    %201 = arith.subf %199, %200 : vector<1x128xf32>
    %202 = vector.extract_strided_slice %194 {offsets = [0, 384], sizes = [1, 128], strides = [1, 1]} : vector<1x512xf32> to vector<1x128xf32>
    %203 = arith.mulf %196, %181 : vector<1x128xf32>
    %204 = arith.mulf %195, %201 : vector<1x128xf32>
    %205 = arith.addf %203, %204 : vector<1x128xf32>
    %206 = math.tanh %205 : vector<1x128xf32>
    %207 = arith.mulf %202, %206 : vector<1x128xf32>
    %c5_70 = arith.constant 5 : index
    %c0_71 = arith.constant 0 : index
    %208 = vector.load %arg6[%c5_70, %c0_71] : memref<8x128xf32, #tpu.memory_space<vmem>>, vector<1x128xf32>
    tpu.vector_store %arg6[%c5_70, %c0_71], %207 {strides = array<i32>} : memref<8x128xf32, #tpu.memory_space<vmem>>, vector<1x128xf32>,
    %c0_72 = arith.constant 0 : index
    %c0_73 = arith.constant 0 : index
    %209 = vector.load %arg1[%c0_72, %c0_73] : memref<128x512xf32, #tpu.memory_space<vmem>>, vector<128x512xf32>
    %cst_74 = arith.constant dense<0.000000e+00> : vector<1x512xf32>
    %210 = tpu.matmul %207, %209, %cst_74 {dimension_numbers = #tpu.dot_dimension_numbers<[1], [0], [0], [1], [0, 0, 1, 1], [], []>} : vector<1x128xf32>, vector<128x512xf32>, vector<1x512xf32> -> vector<1x512xf32>
    %211 = arith.addf %210, %2 : vector<1x512xf32>
    %212 = arith.negf %211 : vector<1x512xf32>
    %213 = math.exp %212 : vector<1x512xf32>
    %cst_75 = arith.constant 1.000000e+00 : f32
    %214 = vector.broadcast %cst_75 : f32 to vector<1x512xf32>
    %215 = arith.addf %214, %213 : vector<1x512xf32>
    %216 = arith.divf %214, %215 : vector<1x512xf32>
    %217 = vector.extract_strided_slice %216 {offsets = [0, 0], sizes = [1, 128], strides = [1, 1]} : vector<1x512xf32> to vector<1x128xf32>
    %218 = vector.extract_strided_slice %216 {offsets = [0, 128], sizes = [1, 128], strides = [1, 1]} : vector<1x512xf32> to vector<1x128xf32>
    %219 = vector.extract_strided_slice %216 {offsets = [0, 256], sizes = [1, 128], strides = [1, 1]} : vector<1x512xf32> to vector<1x128xf32>
    %cst_76 = arith.constant 2.000000e+00 : f32
    %220 = vector.broadcast %cst_76 : f32 to vector<1x128xf32>
    %221 = arith.mulf %220, %219 : vector<1x128xf32>
    %cst_77 = arith.constant 1.000000e+00 : f32
    %222 = vector.broadcast %cst_77 : f32 to vector<1x128xf32>
    %223 = arith.subf %221, %222 : vector<1x128xf32>
    %224 = vector.extract_strided_slice %216 {offsets = [0, 384], sizes = [1, 128], strides = [1, 1]} : vector<1x512xf32> to vector<1x128xf32>
    %225 = arith.mulf %218, %205 : vector<1x128xf32>
    %226 = arith.mulf %217, %223 : vector<1x128xf32>
    %227 = arith.addf %225, %226 : vector<1x128xf32>
    %228 = tpu.iota {dimensions = array<i32: 1>} : vector<1x128xi32>
    %c64_i32_78 = arith.constant 64 : i32
    %229 = vector.broadcast %c64_i32_78 : i32 to vector<1x128xi32>
    %230 = arith.cmpi sge, %228, %229 : vector<1x128xi32>
    %c128_i32 = arith.constant 128 : i32
    %231 = vector.broadcast %c128_i32 : i32 to vector<1x128xi32>
    %232 = arith.cmpi slt, %228, %231 : vector<1x128xi32>
    %233 = arith.andi %230, %232 : vector<1x128xi1>
    %234 = arith.select %233, %227, %205 : vector<1x128xi1>, vector<1x128xf32>
    %235 = math.tanh %234 : vector<1x128xf32>
    %236 = arith.mulf %224, %235 : vector<1x128xf32>
    %237 = arith.select %233, %236, %207 : vector<1x128xi1>, vector<1x128xf32>
    %c6_79 = arith.constant 6 : index
    %c0_80 = arith.constant 0 : index
    %238 = vector.load %arg6[%c6_79, %c0_80] : memref<8x128xf32, #tpu.memory_space<vmem>>, vector<1x128xf32>
    tpu.vector_store %arg6[%c6_79, %c0_80], %237 {strides = array<i32>} : memref<8x128xf32, #tpu.memory_space<vmem>>, vector<1x128xf32>,
    %c0_81 = arith.constant 0 : index
    %c0_82 = arith.constant 0 : index
    %239 = vector.load %arg1[%c0_81, %c0_82] : memref<128x512xf32, #tpu.memory_space<vmem>>, vector<128x512xf32>
    %cst_83 = arith.constant dense<0.000000e+00> : vector<1x512xf32>
    %240 = tpu.matmul %237, %239, %cst_83 {dimension_numbers = #tpu.dot_dimension_numbers<[1], [0], [0], [1], [0, 0, 1, 1], [], []>} : vector<1x128xf32>, vector<128x512xf32>, vector<1x512xf32> -> vector<1x512xf32>
    %241 = arith.addf %240, %2 : vector<1x512xf32>
    %242 = arith.negf %241 : vector<1x512xf32>
    %243 = math.exp %242 : vector<1x512xf32>
    %cst_84 = arith.constant 1.000000e+00 : f32
    %244 = vector.broadcast %cst_84 : f32 to vector<1x512xf32>
    %245 = arith.addf %244, %243 : vector<1x512xf32>
    %246 = arith.divf %244, %245 : vector<1x512xf32>
    %247 = vector.extract_strided_slice %246 {offsets = [0, 0], sizes = [1, 128], strides = [1, 1]} : vector<1x512xf32> to vector<1x128xf32>
    %248 = vector.extract_strided_slice %246 {offsets = [0, 128], sizes = [1, 128], strides = [1, 1]} : vector<1x512xf32> to vector<1x128xf32>
    %249 = vector.extract_strided_slice %246 {offsets = [0, 256], sizes = [1, 128], strides = [1, 1]} : vector<1x512xf32> to vector<1x128xf32>
    %cst_85 = arith.constant 2.000000e+00 : f32
    %250 = vector.broadcast %cst_85 : f32 to vector<1x128xf32>
    %251 = arith.mulf %250, %249 : vector<1x128xf32>
    %cst_86 = arith.constant 1.000000e+00 : f32
    %252 = vector.broadcast %cst_86 : f32 to vector<1x128xf32>
    %253 = arith.subf %251, %252 : vector<1x128xf32>
    %254 = vector.extract_strided_slice %246 {offsets = [0, 384], sizes = [1, 128], strides = [1, 1]} : vector<1x512xf32> to vector<1x128xf32>
    %255 = arith.mulf %248, %234 : vector<1x128xf32>
    %256 = arith.mulf %247, %253 : vector<1x128xf32>
    %257 = arith.addf %255, %256 : vector<1x128xf32>
    %258 = tpu.iota {dimensions = array<i32: 1>} : vector<1x128xi32>
    %c96_i32_87 = arith.constant 96 : i32
    %259 = vector.broadcast %c96_i32_87 : i32 to vector<1x128xi32>
    %260 = arith.cmpi sge, %258, %259 : vector<1x128xi32>
    %c128_i32_88 = arith.constant 128 : i32
    %261 = vector.broadcast %c128_i32_88 : i32 to vector<1x128xi32>
    %262 = arith.cmpi slt, %258, %261 : vector<1x128xi32>
    %263 = arith.andi %260, %262 : vector<1x128xi1>
    %264 = arith.select %263, %257, %234 : vector<1x128xi1>, vector<1x128xf32>
    %265 = math.tanh %264 : vector<1x128xf32>
    %266 = arith.mulf %254, %265 : vector<1x128xf32>
    %267 = arith.select %263, %266, %237 : vector<1x128xi1>, vector<1x128xf32>
    %c7_89 = arith.constant 7 : index
    %c0_90 = arith.constant 0 : index
    %268 = vector.load %arg6[%c7_89, %c0_90] : memref<8x128xf32, #tpu.memory_space<vmem>>, vector<1x128xf32>
    tpu.vector_store %arg6[%c7_89, %c0_90], %267 {strides = array<i32>} : memref<8x128xf32, #tpu.memory_space<vmem>>, vector<1x128xf32>,
    %c0_91 = arith.constant 0 : index
    %c0_92 = arith.constant 0 : index
    %269 = vector.load %arg6[%c0_91, %c0_92] : memref<8x128xf32, #tpu.memory_space<vmem>>, vector<8x128xf32>
    %c0_93 = arith.constant 0 : index
    %c0_94 = arith.constant 0 : index
    %270 = vector.load %arg3[%c0_93, %c0_94] : memref<1x128xf32, #tpu.memory_space<vmem>>, vector<1x128xf32>
    %271 = vector.broadcast %270 : vector<1x128xf32> to vector<8x128xf32>
    %272 = arith.mulf %269, %271 : vector<8x128xf32>
    %cst_95 = arith.constant dense<0.000000e+00> : vector<8xf32>
    %273 = vector.multi_reduction <add>, %272, %cst_95 [1] : vector<8x128xf32> to vector<8xf32>
    %274 = vector.shape_cast %273 : vector<8xf32> to vector<8x1xf32>
    %c0_96 = arith.constant 0 : index
    %c0_97 = arith.constant 0 : index
    %275 = vector.load %arg4[%c0_96, %c0_97] : memref<1x1xf32, #tpu.memory_space<vmem>>, vector<1x1xf32>
    %276 = vector.broadcast %275 : vector<1x1xf32> to vector<8x1xf32>
    %277 = arith.addf %274, %276 : vector<8x1xf32>
    %278 = arith.negf %277 : vector<8x1xf32>
    %279 = math.exp %278 : vector<8x1xf32>
    %cst_98 = arith.constant 1.000000e+00 : f32
    %280 = vector.broadcast %cst_98 : f32 to vector<8x1xf32>
    %281 = arith.addf %280, %279 : vector<8x1xf32>
    %282 = arith.divf %280, %281 : vector<8x1xf32>
    %c0_99 = arith.constant 0 : index
    %c0_100 = arith.constant 0 : index
    %283 = vector.load %arg5[%c0_99, %c0_100] : memref<8x1xf32, #tpu.memory_space<vmem>>, vector<8x1xf32>
    tpu.vector_store %arg5[%c0_99, %c0_100], %282 {strides = array<i32>} : memref<8x1xf32, #tpu.memory_space<vmem>>, vector<8x1xf32>,
    return
  }
}

</mosaic_0001>

<bundles_post_ra>
// kernel: tpu_custom_call.1
= control target key start
LH: loop header
LB: loop body
LE: loop exit
PB: predicated region body
PF: predicated region fallthrough
CT: control target
= control target key end

     0   :  { %s3936_s0 = inlined_call_operand.hbm [shape: f32[8,128], index: 0, kind: input, shape index: {}]   ;;  %s3937_s1 = inlined_call_operand.hbm [shape: f32[128,512], index: 1, kind: input, shape index: {}]   ;;  %s3938_s2 = inlined_call_operand.vmem [shape: f32[1,512], index: 2, kind: input, shape index: {}]   ;;  %s3939_s3 = inlined_call_operand.vmem [shape: f32[1,128], index: 3, kind: input, shape index: {}]   ;;  %s3940_s4 = inlined_call_operand.<no memory space> [shape: f32[1,1], index: 4, kind: input, shape index: {}]   ;;  %s3941_s5 = inlined_call_operand.vmem [shape: f32[8,1], index: 5, kind: output, shape index: {}]  }
   0x1   :  { %v10_v0 = vstv %s3940_s4 }
   0x2   :  { %11 = vst [vmem:[#allocation3] sm:$0x1] %v10_v0 }
   0x3   :  { %12 = vsyncpa [#allocation5], 0 }
   0x4   :  { %13 = vsyncpa [#allocation7], 0  ;;  %s3319_s20 = smov [#allocation4]   ;;  %s3320_s22 = smov [#allocation6]  }
   0x5   :  { %s20_s21 = sshll.u32 %s3319_s20, 4  ;;  %s29_s23 = sshll.u32 %s3320_s22, 4  ;;  %s21_s21 = int_to_ptr.vmem [resolvable:$true] %s20_s21  ;;  %s3357_s23 = int_to_ptr.vmem [resolvable:$true] %s29_s23 }
   0x6   :  { %s3271_s26 = scalar_lea.hbm %s3936_s0, 128 }
   0x7   :  { %p3272_p0 = scmp.ne.s32.totalorder %s3936_s0, %s3271_s26  ;;  %p3275_p1 = scmp.lt.u32.totalorder %s3271_s26, %s3936_s0 }
   0x9   :  { %p3277_p2 = pnand %p3275_p1, %p3272_p0 }
   0xb   :  { %3280 = shalt.err (!%p3277_p2)
}
   0xc   :  { %s3281_s30 = scalar_lea.vmem %s21_s21, 128  ;;  %p3286_p4 = scmp.lt.s32.totalorder %s21_s21, %s21_s21 }
   0xd   :  { %p3282_p3 = scmp.ne.s32.totalorder %s21_s21, %s3281_s30  ;;  %p3287_p5 = scmp.lt.s32.totalorder %s3281_s30, %s3281_s30 }
   0xf   :  { %p3288_p6 = por %p3287_p5, %p3286_p4 }
  0x11   :  { %p3289_p7 = pnand %p3288_p6, %p3282_p3 }
  0x13   :  { %3292 = shalt.err (!%p3289_p7)
}
  0x14   :  { %23 = dma.hbm_to_vmem [thread:$0]  %s3936_s0, 128, %s21_s21, [#allocation5]  }
  0x15   :  { %s3293_s10 = scalar_lea.hbm %s3937_s1, 8192 }
  0x16   :  { %p3294_p8 = scmp.ne.s32.totalorder %s3937_s1, %s3293_s10  ;;  %p3297_p9 = scmp.lt.u32.totalorder %s3293_s10, %s3937_s1 }
  0x18   :  { %p3299_p10 = pnand %p3297_p9, %p3294_p8 }
  0x1a   :  { %3302 = shalt.err (!%p3299_p10)
}
  0x1b   :  { %s3303_s15 = scalar_lea.vmem %s3357_s23, 8192  ;;  %p3308_p12 = scmp.lt.s32.totalorder %s3357_s23, %s3357_s23 }
  0x1c   :  { %p3304_p11 = scmp.ne.s32.totalorder %s3357_s23, %s3303_s15  ;;  %p3309_p13 = scmp.lt.s32.totalorder %s3303_s15, %s3303_s15 }
  0x1e   :  { %p3310_p0 = por %p3309_p13, %p3308_p12 }
  0x20   :  { %p3311_p1 = pnand %p3310_p0, %p3304_p11 }
  0x22   :  { %3314 = shalt.err (!%p3311_p1)
}
  0x23   :  { %s3321_s0 = smov 512   ;;  %s3322_s16 = smov 32  }
  0x24   :  { %35 = dma.hbm_to_vmem [thread:$0]  %s3937_s1, 8192, %s3357_s23, [#allocation7], %s3321_s0, %s3321_s0, %s3322_s16  }
  0x25   :  { %3315 = dma.done.wait [#allocation5], 128  }
  0x26   :  { %3316 = vsyncadd [#allocation5], 4294967168 }
  0x27   :  { %3317 = dma.done.wait [#allocation7], 8192  }
  0x28   :  { %3318 = vsyncadd [#allocation7], 4294959104  ;;  %v3323_v1 = vmov 0.0   ;;  %v54_v2 = vld [vmem:[#allocation6 + $0x18] sm:$0xff]  ;;  %v53_v4 = vld [vmem:[#allocation6 + $0x10] sm:$0xff]  ;;  %vm2381_vm7 = vcmask 7168  }
  0x29   :  { %271 = vmatprep.mubr.f32.mxu1 %v3323_v1  ;;  %200 = vmatprep.mubr.f32.mxu0 %v3323_v1  ;;  %v58_v3 = vld [vmem:[#allocation6 + $0x38] sm:$0xff]  ;;  %v57_v6 = vld [vmem:[#allocation6 + $0x30] sm:$0xff]  ;;  %v52_v7 = vld [vmem:[#allocation6 + $0x8] sm:$0xff] }
  0x2a   :  { %v3390_v5 = vpack.c.bf16 %v58_v3, %v54_v2  ;;  %v56_v8 = vld [vmem:[#allocation6 + $0x28] sm:$0xff]  ;;  %v3392_v9 = vpack.c.bf16 %v57_v6, %v53_v4  ;;  %v51_v11 = vld [vmem:[#allocation6] sm:$0xff]  ;;  %v62_v13 = vld [vmem:[#allocation6 + $0x58] sm:$0xff] }
  0x2b   :  { %v3394_v10 = vpack.c.bf16 %v56_v8, %v52_v7  ;;  %v55_v12 = vld [vmem:[#allocation6 + $0x20] sm:$0xff]  ;;  %v66_v15 = vld [vmem:[#allocation6 + $0x78] sm:$0xff]  ;;  %v61_v16 = vld [vmem:[#allocation6 + $0x50] sm:$0xff] }
  0x2c   :  { %2475 = vmatprep.subr.bf16.mxu1 %v3390_v5  ;;  %v3397_v14 = vpack.c.bf16 %v55_v12, %v51_v11  ;;  %v65_v17 = vld [vmem:[#allocation6 + $0x70] sm:$0xff]  ;;  %v3401_v18 = vpack.c.bf16 %v66_v15, %v62_v13  ;;  %v60_v20 = vld [vmem:[#allocation6 + $0x48] sm:$0xff]  ;;  %v59_v22 = vld [vmem:[#allocation6 + $0x40] sm:$0xff] }
  0x2d   :  { %2477 = vmatpush1.bf16.msra.mxu1 %v3392_v9  ;;  %2443 = vmatprep.subr.bf16.mxu0 %v3394_v10  ;;  %v3403_v19 = vpack.c.bf16 %v65_v17, %v61_v16  ;;  %v64_v21 = vld [vmem:[#allocation6 + $0x68] sm:$0xff]  ;;  %v63_v24 = vld [vmem:[#allocation6 + $0x60] sm:$0xff]  ;;  %v70_v25 = vld [vmem:[#allocation6 + $0x98] sm:$0xff] }
  0x2e   :  { %2445 = vmatpush1.bf16.msra.mxu0 %v3397_v14  ;;  %v3406_v23 = vpack.c.bf16 %v64_v21, %v60_v20  ;;  %v74_v26 = vld [vmem:[#allocation6 + $0xb8] sm:$0xff]  ;;  %2479 = vmatprep.subr.bf16.mxu1 %v3401_v18  ;;  %v3409_v27 = vpack.c.bf16 %v63_v24, %v59_v22  ;;  %v69_v29 = vld [vmem:[#allocation6 + $0x90] sm:$0xff]  ;;  %v68_v31 = vld [vmem:[#allocation6 + $0x88] sm:$0xff] }
  0x2f   :  { %v3411_v28 = vpack.c.bf16 %v74_v26, %v70_v25  ;;  %v73_v30 = vld [vmem:[#allocation6 + $0xb0] sm:$0xff]  ;;  %v72_v32 = vld [vmem:[#allocation6 + $0xa8] sm:$0xff]  ;;  %v67_v33 = vld [vmem:[#allocation6 + $0x80] sm:$0xff] }
  0x30   :  { %2447 = vmatprep.subr.bf16.mxu0 %v3406_v23  ;;  %v71_v34 = vld [vmem:[#allocation6 + $0xa0] sm:$0xff]  ;;  %v3415_v35 = vpack.c.bf16 %v73_v30, %v69_v29  ;;  %v3417_v36 = vpack.c.bf16 %v72_v32, %v68_v31  ;;  %v78_v37 = vld [vmem:[#allocation6 + $0xd8] sm:$0xff]  ;;  %v77_v39 = vld [vmem:[#allocation6 + $0xd0] sm:$0xff] }
  0x31   :  { %2481 = vmatpush1.bf16.msra.mxu1 %v3403_v19  ;;  %v82_v38 = vld [vmem:[#allocation6 + $0xf8] sm:$0xff]  ;;  %v3421_v40 = vpack.c.bf16 %v71_v34, %v67_v33  ;;  %v81_v42 = vld [vmem:[#allocation6 + $0xf0] sm:$0xff]  ;;  %v76_v43 = vld [vmem:[#allocation6 + $0xc8] sm:$0xff] }
  0x32   :  { %2449 = vmatpush1.bf16.msra.mxu0 %v3409_v27  ;;  %2483 = vmatprep.subr.bf16.mxu1 %v3411_v28  ;;  %v3423_v41 = vpack.c.bf16 %v82_v38, %v78_v37  ;;  %v80_v44 = vld [vmem:[#allocation6 + $0xe8] sm:$0xff]  ;;  %v75_v46 = vld [vmem:[#allocation6 + $0xc0] sm:$0xff]  ;;  %v86_v48 = vld [vmem:[#allocation6 + $0x118] sm:$0xff]  ;;  %v3429_v50 = vpack.c.bf16 %v81_v42, %v77_v39 }
  0x33   :  { %2451 = vmatprep.subr.bf16.mxu0 %v3417_v36  ;;  %v3426_v45 = vpack.c.bf16 %v80_v44, %v76_v43  ;;  %v79_v47 = vld [vmem:[#allocation6 + $0xe0] sm:$0xff]  ;;  %v90_v49 = vld [vmem:[#allocation6 + $0x138] sm:$0xff]  ;;  %v84_v51 = vld [vmem:[#allocation6 + $0x108] sm:$0xff] }
  0x34   :  { %v88_v52 = vld [vmem:[#allocation6 + $0x128] sm:$0xff]  ;;  %v3433_v53 = vpack.c.bf16 %v79_v47, %v75_v46  ;;  %v3435_v54 = vpack.c.bf16 %v90_v49, %v86_v48  ;;  %v85_v55 = vld [vmem:[#allocation6 + $0x110] sm:$0xff]  ;;  %v83_v57 = vld [vmem:[#allocation6 + $0x100] sm:$0xff] }
  0x35   :  { %2485 = vmatpush1.bf16.msra.mxu1 %v3415_v35  ;;  %v89_v56 = vld [vmem:[#allocation6 + $0x130] sm:$0xff]  ;;  %v3438_v58 = vpack.c.bf16 %v88_v52, %v84_v51  ;;  %v87_v59 = vld [vmem:[#allocation6 + $0x120] sm:$0xff]  ;;  %v94_v60 = vld [vmem:[#allocation6 + $0x158] sm:$0xff]  ;;  %v116_v51 = vlaneseq }
  0x36   :  { %2453 = vmatpush1.bf16.msra.mxu0 %v3421_v40  ;;  %2487 = vmatprep.subr.bf16.mxu1 %v3423_v41  ;;  %v98_v61 = vld [vmem:[#allocation6 + $0x178] sm:$0xff]  ;;  %v92_v62 = vld [vmem:[#allocation6 + $0x148] sm:$0xff]  ;;  %v3441_v0 = vpack.c.bf16 %v89_v56, %v85_v55  ;;  %v3445_v2 = vpack.c.bf16 %v87_v59, %v83_v57  ;;  %v93_v4 = vld [vmem:[#allocation6 + $0x150] sm:$0xff] }
  0x37   :  { %2455 = vmatprep.subr.bf16.mxu0 %v3426_v45  ;;  %v96_v63 = vld [vmem:[#allocation6 + $0x168] sm:$0xff]  ;;  %v3447_v3 = vpack.c.bf16 %v98_v61, %v94_v60  ;;  %v97_v6 = vld [vmem:[#allocation6 + $0x170] sm:$0xff]  ;;  %v91_v7 = vld [vmem:[#allocation6 + $0x140] sm:$0xff]  ;;  %v117_v52 = vshrl.u32 %v116_v51, 7 }
  0x38   :  { %v3450_v8 = vpack.c.bf16 %v96_v63, %v92_v62  ;;  %v95_v11 = vld [vmem:[#allocation6 + $0x160] sm:$0xff]  ;;  %v102_v12 = vld [vmem:[#allocation6 + $0x198] sm:$0xff]  ;;  %v100_v15 = vld [vmem:[#allocation6 + $0x188] sm:$0xff]  ;;  %v3453_v17 = vpack.c.bf16 %v97_v6, %v93_v4 }
  0x39   :  { %2489 = vmatpush1.bf16.msra.mxu1 %v3429_v50  ;;  %v106_v13 = vld [vmem:[#allocation6 + $0x1b8] sm:$0xff]  ;;  %v104_v16 = vld [vmem:[#allocation6 + $0x1a8] sm:$0xff]  ;;  %v3457_v20 = vpack.c.bf16 %v95_v11, %v91_v7  ;;  %v101_v22 = vld [vmem:[#allocation6 + $0x190] sm:$0xff]  ;;  %v126_v55 = vsub.s32 2, %v117_v52  ;;  %v118_v57 = vsub.s32 0, %v117_v52  ;;  %v122_v59 = vsub.s32 1, %v117_v52 }
  0x3a   :  { %2457 = vmatpush1.bf16.msra.mxu0 %v3433_v53  ;;  %2491 = vmatprep.subr.bf16.mxu1 %v3435_v54  ;;  %v3459_v21 = vpack.c.bf16 %v106_v13, %v102_v12  ;;  %v105_v24 = vld [vmem:[#allocation6 + $0x1b0] sm:$0xff]  ;;  %v99_v25 = vld [vmem:[#allocation6 + $0x180] sm:$0xff]  ;;  %v3462_v26 = vpack.c.bf16 %v104_v16, %v100_v15  ;;  %v110_v30 = vld [vmem:[#allocation6 + $0x1d8] sm:$0xff]  ;;  %v130_v15 = vsub.s32 3, %v117_v52 }
  0x3b   :  { %2459 = vmatprep.subr.bf16.mxu0 %v3438_v58  ;;  %v103_v29 = vld [vmem:[#allocation6 + $0x1a0] sm:$0xff]  ;;  %v114_v31 = vld [vmem:[#allocation6 + $0x1f8] sm:$0xff]  ;;  %v108_v32 = vld [vmem:[#allocation6 + $0x1c8] sm:$0xff]  ;;  %v3465_v34 = vpack.c.bf16 %v105_v24, %v101_v22 }
  0x3c   :  { %v112_v33 = vld [vmem:[#allocation6 + $0x1e8] sm:$0xff]  ;;  %v3469_v37 = vpack.c.bf16 %v103_v29, %v99_v25  ;;  %v3471_v38 = vpack.c.bf16 %v114_v31, %v110_v30  ;;  %v109_v39 = vld [vmem:[#allocation6 + $0x1d0] sm:$0xff]  ;;  %v107_v44 = vld [vmem:[#allocation6 + $0x1c0] sm:$0xff] }
  0x3d   :  { %2493 = vmatpush1.bf16.msra.mxu1 %v3441_v0  ;;  %v113_v42 = vld [vmem:[#allocation6 + $0x1f0] sm:$0xff]  ;;  %v3474_v43 = vpack.c.bf16 %v112_v33, %v108_v32  ;;  %v111_v46 = vld [vmem:[#allocation6 + $0x1e0] sm:$0xff]  ;;  %v49_v49 = vld [vmem:[#allocation4] sm:$0x1] }
  0x3e   :  { %2461 = vmatpush1.bf16.msra.mxu0 %v3445_v2  ;;  %2495 = vmatprep.subr.bf16.mxu1 %v3447_v3  ;;  %v3477_v47 = vpack.c.bf16 %v113_v42, %v109_v39  ;;  %v3481_v48 = vpack.c.bf16 %v111_v46, %v107_v44  ;;  %v48_v56 = vld [vmem:[%s3938_s2] sm:$0xf]  ;;  %v3537_v46 = vand.u32 127, %v116_v51 }
  0x3f   :  { %2463 = vmatprep.subr.bf16.mxu0 %v3450_v8  ;;  %v3525_v60 = vrot.slane %v48_v56, %v126_v55  ;;  %v3527_v61 = vrot.slane %v48_v56, %v118_v57  ;;  %v3529_v62 = vrot.slane %v48_v56, %v122_v59  ;;  %v3534_v25 = vrot.slane %v48_v56, %v130_v15  ;;  %v316_v15 = vld [vmem:[#allocation4 + $0x1] sm:$0x1] }
  0x40   :  { %vm309_vm0 = vcmp.ge.s32.totalorder %v3537_v46, 32  ;;  %vm310_vm1 = vcmp.lt.s32.totalorder %v3537_v46, 64  ;;  %vm489_vm3 = vcmp.lt.s32.totalorder %v3537_v46, 96  ;;  %vm2106_vm5 = vcmp.ge.s32.totalorder %v3537_v46, 64 }
  0x41   :  { %2497 = vmatpush1.bf16.msra.mxu1 %v3453_v17  ;;  %vm311_vm2 = vmand %vm309_vm0, %vm310_vm1  ;;  %vm2349_vm6 = vcmp.ge.s32.totalorder %v3537_v46, 96 }
  0x42   :  { %2465 = vmatpush1.bf16.msra.mxu0 %v3457_v20  ;;  %2499 = vmatprep.subr.bf16.mxu1 %v3459_v21  ;;  %vm490_vm4 = vmand %vm309_vm0, %vm489_vm3 }
  0x43   :  { %2467 = vmatprep.subr.bf16.mxu0 %v3462_v26 }
  0x45   :  { %2501 = vmatpush1.bf16.msra.mxu1 %v3465_v34 }
  0x46   :  { %2469 = vmatpush1.bf16.msra.mxu0 %v3469_v37  ;;  %2503 = vmatprep.subr.bf16.mxu1 %v3471_v38 }
  0x47   :  { %2471 = vmatprep.subr.bf16.mxu0 %v3474_v43 }
  0x49   :  { %2505 = vmatpush1.bf16.msra.mxu1 %v3477_v47 }
  0x4a   :  { %2473 = vmatpush1.bf16.msra.mxu0 %v3481_v48  ;;  %2539 = vmatprep.subr.bf16.mxu1 %v3390_v5 }
  0x4b   :  { %2507 = vmatprep.subr.bf16.mxu0 %v3394_v10 }
  0x4c   :  { %272 = vmatmul.mubr.f32.vlgmr.msra.gmra.mrb[0].mxu1 %v49_v49 }
  0x4d   :  { %201 = vmatmul.mubr.f32.vlgmr.msra.gmra.mrb[0].mxu0 %v49_v49  ;;  %2541 = vmatpush1.bf16.msra.mxu1 %v3392_v9 }
  0x4e   :  { %2509 = vmatpush1.bf16.msra.mxu0 %v3397_v14  ;;  %2543 = vmatprep.subr.bf16.mxu1 %v3401_v18 }
  0x4f   :  { %2511 = vmatprep.subr.bf16.mxu0 %v3406_v23  ;;  %382 = vmatprep.mubr.f32.mxu0 %v3323_v1 }
  0x50   :  { %453 = vmatprep.mubr.f32.mxu1 %v3323_v1 }
  0x51   :  { %2545 = vmatpush1.bf16.msra.mxu1 %v3403_v19 }
  0x52   :  { %2513 = vmatpush1.bf16.msra.mxu0 %v3409_v27  ;;  %2547 = vmatprep.subr.bf16.mxu1 %v3411_v28 }
  0x53   :  { %2515 = vmatprep.subr.bf16.mxu0 %v3417_v36 }
  0x55   :  { %2549 = vmatpush1.bf16.msra.mxu1 %v3415_v35 }
  0x56   :  { %2517 = vmatpush1.bf16.msra.mxu0 %v3421_v40  ;;  %2551 = vmatprep.subr.bf16.mxu1 %v3423_v41 }
  0x57   :  { %2519 = vmatprep.subr.bf16.mxu0 %v3426_v45 }
  0x59   :  { %2553 = vmatpush1.bf16.msra.mxu1 %v3429_v50 }
  0x5a   :  { %2521 = vmatpush1.bf16.msra.mxu0 %v3433_v53  ;;  %2555 = vmatprep.subr.bf16.mxu1 %v3435_v54 }
  0x5b   :  { %2523 = vmatprep.subr.bf16.mxu0 %v3438_v58 }
  0x5d   :  { %2557 = vmatpush1.bf16.msra.mxu1 %v3441_v0 }
  0x5e   :  { %2525 = vmatpush1.bf16.msra.mxu0 %v3445_v2  ;;  %2559 = vmatprep.subr.bf16.mxu1 %v3447_v3 }
  0x5f   :  { %2527 = vmatprep.subr.bf16.mxu0 %v3450_v8 }
  0x61   :  { %2561 = vmatpush1.bf16.msra.mxu1 %v3453_v17 }
  0x62   :  { %2529 = vmatpush1.bf16.msra.mxu0 %v3457_v20  ;;  %2563 = vmatprep.subr.bf16.mxu1 %v3459_v21 }
  0x63   :  { %2531 = vmatprep.subr.bf16.mxu0 %v3462_v26 }
  0x65   :  { %2565 = vmatpush1.bf16.msra.mxu1 %v3465_v34 }
  0x66   :  { %2533 = vmatpush1.bf16.msra.mxu0 %v3469_v37  ;;  %2567 = vmatprep.subr.bf16.mxu1 %v3471_v38 }
  0x67   :  { %2535 = vmatprep.subr.bf16.mxu0 %v3474_v43 }
  0x69   :  { %2569 = vmatpush1.bf16.msra.mxu1 %v3477_v47 }
  0x6a   :  { %2537 = vmatpush1.bf16.msra.mxu0 %v3481_v48  ;;  %2603 = vmatprep.subr.bf16.mxu1 %v3390_v5 }
  0x6b   :  { %2571 = vmatprep.subr.bf16.mxu0 %v3394_v10 }
 0x11f   :  { %v273_v63 = vpop.f32.mrb[0].mxu1 }
 0x120   :  { %v274_v4 = vadd.f32 %v273_v63, %v3525_v60  ;;  %v275_v6 = vpop.f32.mrb[1].mxu1  ;;  %v202_v7 = vpop.f32.mrb[0].mxu0 }
 0x121   :  { %v203_v11 = vadd.f32 %v202_v7, %v3527_v61  ;;  %v204_v12 = vpop.f32.mrb[1].mxu0  ;;  %v276_v29 = vadd.f32 %v275_v6, %v3534_v25 }
 0x122   :  { %v2391_v13 = vmul.f32 -1.442695, %v274_v4  ;;  %v205_v16 = vadd.f32 %v204_v12, %v3529_v62 }
 0x123   :  { %v2389_v22 = vmul.f32 -1.442695, %v203_v11  ;;  %v2392_v31 = vmul.f32 -1.442695, %v276_v29 }
 0x124   :  { %3087 = vpow2.f32 %v2391_v13  ;;  %v2390_v24 = vmul.f32 -1.442695, %v205_v16 }
 0x125   :  { %3089 = vpow2.f32 %v2389_v22 }
 0x126   :  { %3091 = vpow2.f32 %v2390_v24 }
 0x12e   :  { %v3088_v30 = vpop.eup %3087 }
 0x12f   :  { %v292_v32 = vadd.f32 1.0, %v3088_v30  ;;  %v3090_v33 = vpop.eup %3089 }
 0x130   :  { %v3092_v39 = vpop.eup %3091  ;;  %v290_v42 = vadd.f32 1.0, %v3090_v33 }
 0x131   :  { %3093 = vrcp.f32 %v292_v32  ;;  %v291_v44 = vadd.f32 1.0, %v3092_v39 }
 0x132   :  { %3095 = vpow2.f32 %v2392_v31 }
 0x133   :  { %3097 = vrcp.f32 %v290_v42 }
 0x134   :  { %3099 = vrcp.f32 %v291_v44 }
 0x13b   :  { %v3094_v49 = vpop.eup %3093 }
 0x13c   :  { %v3096_v52 = vpop.eup %3095  ;;  %v302_v55 = vmul.f32 2.0, %v3094_v49 }
 0x13d   :  { %v3098_v56 = vpop.eup %3097  ;;  %v293_v4 = vadd.f32 1.0, %v3096_v52 }
 0x13e   :  { %v3100_v57 = vpop.eup %3099  ;;  %v2393_v59 = vadd.f32 -1.0, %v302_v55 }
 0x13f   :  { %v304_v63 = vmul.f32 0.0, %v3100_v57  ;;  %3101 = vrcp.f32 %v293_v4 }
 0x140   :  { %v305_v6 = vmul.f32 %v3098_v56, %v2393_v59 }
 0x142   :  { %v306_v7 = vadd.f32 %v305_v6, %v304_v63 }
 0x144   :  { %v3543_v51 = vsel %vm311_vm2, %v306_v7, 0.0 }
 0x145   :  { %3103 = vtanh.f32 %v3543_v51 }
 0x149   :  { %v3102_v11 = vpop.eup %3101 }
 0x14f   :  { %v3104_v12 = vpop.eup %3103 }
 0x150   :  { %v314_v13 = vmul.f32 %v3104_v12, %v3102_v11 }
 0x152   :  { %v3546_v16 = vsel %vm311_vm2, %v314_v13, 0.0 }
 0x153   :  { %v317_v22 = vadd.f32 %v316_v15, %v3546_v16 }
 0x155   :  { %383 = vmatmul.mubr.f32.vlgmr.msra.gmra.mrb[2].mxu0 %v317_v22  ;;  %454 = vmatmul.mubr.f32.vlgmr.msra.gmra.mrb[2].mxu1 %v317_v22 }
 0x156   :  { %2573 = vmatpush1.bf16.msra.mxu0 %v3397_v14  ;;  %2605 = vmatpush1.bf16.msra.mxu1 %v3392_v9 }
 0x157   :  { %2575 = vmatprep.subr.bf16.mxu0 %v3406_v23  ;;  %2607 = vmatprep.subr.bf16.mxu1 %v3401_v18 }
 0x158   :  { %561 = vmatprep.mubr.f32.mxu0 %v3323_v1  ;;  %632 = vmatprep.mubr.f32.mxu1 %v3323_v1 }
 0x15a   :  { %2577 = vmatpush1.bf16.msra.mxu0 %v3409_v27  ;;  %2609 = vmatpush1.bf16.msra.mxu1 %v3403_v19 }
 0x15b   :  { %2579 = vmatprep.subr.bf16.mxu0 %v3417_v36  ;;  %2611 = vmatprep.subr.bf16.mxu1 %v3411_v28 }
 0x15e   :  { %2581 = vmatpush1.bf16.msra.mxu0 %v3421_v40  ;;  %2613 = vmatpush1.bf16.msra.mxu1 %v3415_v35 }
 0x15f   :  { %2583 = vmatprep.subr.bf16.mxu0 %v3426_v45  ;;  %2615 = vmatprep.subr.bf16.mxu1 %v3423_v41 }
 0x162   :  { %2585 = vmatpush1.bf16.msra.mxu0 %v3433_v53  ;;  %2617 = vmatpush1.bf16.msra.mxu1 %v3429_v50 }
 0x163   :  { %2587 = vmatprep.subr.bf16.mxu0 %v3438_v58  ;;  %2619 = vmatprep.subr.bf16.mxu1 %v3435_v54 }
 0x166   :  { %2589 = vmatpush1.bf16.msra.mxu0 %v3445_v2  ;;  %2621 = vmatpush1.bf16.msra.mxu1 %v3441_v0 }
 0x167   :  { %2591 = vmatprep.subr.bf16.mxu0 %v3450_v8  ;;  %2623 = vmatprep.subr.bf16.mxu1 %v3447_v3 }
 0x16a   :  { %2593 = vmatpush1.bf16.msra.mxu0 %v3457_v20  ;;  %2625 = vmatpush1.bf16.msra.mxu1 %v3453_v17 }
 0x16b   :  { %2595 = vmatprep.subr.bf16.mxu0 %v3462_v26  ;;  %2627 = vmatprep.subr.bf16.mxu1 %v3459_v21 }
 0x16e   :  { %2597 = vmatpush1.bf16.msra.mxu0 %v3469_v37  ;;  %2629 = vmatpush1.bf16.msra.mxu1 %v3465_v34 }
 0x16f   :  { %2599 = vmatprep.subr.bf16.mxu0 %v3474_v43  ;;  %2631 = vmatprep.subr.bf16.mxu1 %v3471_v38 }
 0x172   :  { %2601 = vmatpush1.bf16.msra.mxu0 %v3481_v48  ;;  %2633 = vmatpush1.bf16.msra.mxu1 %v3477_v47 }
 0x173   :  { %2635 = vmatprep.subr.bf16.mxu0 %v3394_v10  ;;  %2667 = vmatprep.subr.bf16.mxu1 %v3390_v5 }
 0x228   :  { %v384_v24 = vpop.f32.mrb[2].mxu0  ;;  %v455_v29 = vpop.f32.mrb[2].mxu1 }
 0x229   :  { %v385_v30 = vadd.f32 %v384_v24, %v3527_v61  ;;  %v456_v31 = vadd.f32 %v455_v29, %v3525_v60  ;;  %v386_v32 = vpop.f32.mrb[3].mxu0  ;;  %v457_v33 = vpop.f32.mrb[3].mxu1 }
 0x22a   :  { %v387_v39 = vadd.f32 %v386_v32, %v3529_v62  ;;  %v458_v52 = vadd.f32 %v457_v33, %v3534_v25 }
 0x22b   :  { %v2394_v42 = vmul.f32 -1.442695, %v385_v30  ;;  %v2396_v44 = vmul.f32 -1.442695, %v456_v31 }
 0x22c   :  { %v2395_v49 = vmul.f32 -1.442695, %v387_v39  ;;  %v2397_v57 = vmul.f32 -1.442695, %v458_v52 }
 0x22d   :  { %3105 = vpow2.f32 %v2394_v42 }
 0x22e   :  { %3107 = vpow2.f32 %v2396_v44  ;;  %v495_v44 = vld [vmem:[#allocation4 + $0x2] sm:$0x1] }
 0x22f   :  { %3109 = vpow2.f32 %v2395_v49 }
 0x237   :  { %v3106_v55 = vpop.eup %3105 }
 0x238   :  { %v3108_v56 = vpop.eup %3107  ;;  %v472_v6 = vadd.f32 1.0, %v3106_v55 }
 0x239   :  { %v3110_v59 = vpop.eup %3109  ;;  %v474_v63 = vadd.f32 1.0, %v3108_v56 }
 0x23a   :  { %v473_v4 = vadd.f32 1.0, %v3110_v59 }
 0x23b   :  { %3111 = vrcp.f32 %v474_v63 }
 0x23c   :  { %3113 = vpow2.f32 %v2397_v57 }
 0x23d   :  { %3115 = vrcp.f32 %v473_v4 }
 0x23e   :  { %3117 = vrcp.f32 %v472_v6 }
 0x245   :  { %v3112_v7 = vpop.eup %3111 }
 0x246   :  { %v3114_v11 = vpop.eup %3113  ;;  %v484_v12 = vmul.f32 2.0, %v3112_v7 }
 0x247   :  { %v3116_v13 = vpop.eup %3115  ;;  %v475_v30 = vadd.f32 1.0, %v3114_v11 }
 0x248   :  { %v2398_v15 = vadd.f32 -1.0, %v484_v12  ;;  %v3118_v22 = vpop.eup %3117  ;;  %v486_v29 = vmul.f32 %v3116_v13, %v3543_v51 }
 0x249   :  { %3119 = vrcp.f32 %v475_v30 }
 0x24a   :  { %v487_v24 = vmul.f32 %v3118_v22, %v2398_v15 }
 0x24c   :  { %v488_v31 = vadd.f32 %v487_v24, %v486_v29 }
 0x24e   :  { %v3592_v32 = vsel %vm490_vm4, %v488_v31, %v3543_v51 }
 0x24f   :  { %3121 = vtanh.f32 %v3592_v32 }
 0x253   :  { %v3120_v33 = vpop.eup %3119 }
 0x259   :  { %v3122_v39 = vpop.eup %3121 }
 0x25a   :  { %v493_v42 = vmul.f32 %v3122_v39, %v3120_v33 }
 0x25c   :  { %v494_v49 = vsel %vm490_vm4, %v493_v42, %v3546_v16 }
 0x25d   :  { %v496_v52 = vadd.f32 %v495_v44, %v494_v49 }
 0x25f   :  { %562 = vmatmul.mubr.f32.vlgmr.msra.gmra.mrb[4].mxu0 %v496_v52  ;;  %633 = vmatmul.mubr.f32.vlgmr.msra.gmra.mrb[4].mxu1 %v496_v52 }
 0x260   :  { %2637 = vmatpush1.bf16.msra.mxu0 %v3397_v14  ;;  %2669 = vmatpush1.bf16.msra.mxu1 %v3392_v9 }
 0x261   :  { %2639 = vmatprep.subr.bf16.mxu0 %v3406_v23  ;;  %2671 = vmatprep.subr.bf16.mxu1 %v3401_v18 }
 0x262   :  { %801 = vmatprep.mubr.f32.mxu0 %v3323_v1  ;;  %872 = vmatprep.mubr.f32.mxu1 %v3323_v1 }
 0x264   :  { %2641 = vmatpush1.bf16.msra.mxu0 %v3409_v27  ;;  %2673 = vmatpush1.bf16.msra.mxu1 %v3403_v19 }
 0x265   :  { %2643 = vmatprep.subr.bf16.mxu0 %v3417_v36  ;;  %2675 = vmatprep.subr.bf16.mxu1 %v3411_v28 }
 0x268   :  { %2645 = vmatpush1.bf16.msra.mxu0 %v3421_v40  ;;  %2677 = vmatpush1.bf16.msra.mxu1 %v3415_v35 }
 0x269   :  { %2647 = vmatprep.subr.bf16.mxu0 %v3426_v45  ;;  %2679 = vmatprep.subr.bf16.mxu1 %v3423_v41 }
 0x26c   :  { %2649 = vmatpush1.bf16.msra.mxu0 %v3433_v53  ;;  %2681 = vmatpush1.bf16.msra.mxu1 %v3429_v50 }
 0x26d   :  { %2651 = vmatprep.subr.bf16.mxu0 %v3438_v58  ;;  %2683 = vmatprep.subr.bf16.mxu1 %v3435_v54 }
 0x270   :  { %2653 = vmatpush1.bf16.msra.mxu0 %v3445_v2  ;;  %2685 = vmatpush1.bf16.msra.mxu1 %v3441_v0 }
 0x271   :  { %2655 = vmatprep.subr.bf16.mxu0 %v3450_v8  ;;  %2687 = vmatprep.subr.bf16.mxu1 %v3447_v3 }
 0x274   :  { %2657 = vmatpush1.bf16.msra.mxu0 %v3457_v20  ;;  %2689 = vmatpush1.bf16.msra.mxu1 %v3453_v17 }
 0x275   :  { %2659 = vmatprep.subr.bf16.mxu0 %v3462_v26  ;;  %2691 = vmatprep.subr.bf16.mxu1 %v3459_v21 }
 0x278   :  { %2661 = vmatpush1.bf16.msra.mxu0 %v3469_v37  ;;  %2693 = vmatpush1.bf16.msra.mxu1 %v3465_v34 }
 0x279   :  { %2663 = vmatprep.subr.bf16.mxu0 %v3474_v43  ;;  %2695 = vmatprep.subr.bf16.mxu1 %v3471_v38 }
 0x27c   :  { %2665 = vmatpush1.bf16.msra.mxu0 %v3481_v48  ;;  %2697 = vmatpush1.bf16.msra.mxu1 %v3477_v47 }
 0x27d   :  { %2699 = vmatprep.subr.bf16.mxu0 %v3394_v10  ;;  %2731 = vmatprep.subr.bf16.mxu1 %v3390_v5 }
 0x332   :  { %v563_v51 = vpop.f32.mrb[4].mxu0  ;;  %v634_v16 = vpop.f32.mrb[4].mxu1 }
 0x333   :  { %v564_v55 = vadd.f32 %v563_v51, %v3527_v61  ;;  %v635_v56 = vadd.f32 %v634_v16, %v3525_v60  ;;  %v565_v57 = vpop.f32.mrb[5].mxu0  ;;  %v636_v59 = vpop.f32.mrb[5].mxu1 }
 0x334   :  { %v566_v63 = vadd.f32 %v565_v57, %v3529_v62  ;;  %v637_v10 = vadd.f32 %v636_v59, %v3534_v25 }
 0x335   :  { %v2399_v4 = vmul.f32 -1.442695, %v564_v55  ;;  %v2401_v6 = vmul.f32 -1.442695, %v635_v56  ;;  %v671_v56 = vld [vmem:[#allocation4 + $0x3] sm:$0x1] }
 0x336   :  { %v2400_v7 = vmul.f32 -1.442695, %v566_v63  ;;  %v2402_v12 = vmul.f32 -1.442695, %v637_v10  ;;  %v1156_v10 = vld [vmem:[#allocation6 + $0x18] sm:$0xff] }
 0x337   :  { %3123 = vpow2.f32 %v2399_v4 }
 0x338   :  { %3125 = vpow2.f32 %v2401_v6  ;;  %v1154_v6 = vld [vmem:[#allocation6 + $0x8] sm:$0xff] }
 0x339   :  { %3127 = vpow2.f32 %v2400_v7  ;;  %v1158_v7 = vld [vmem:[#allocation6 + $0x28] sm:$0xff] }
 0x341   :  { %v3124_v11 = vpop.eup %3123 }
 0x342   :  { %v3126_v5 = vpop.eup %3125  ;;  %v651_v24 = vadd.f32 1.0, %v3124_v11  ;;  %v3680_v11 = vpack.c.bf16 %v1158_v7, %v1154_v6  ;;  %v1187_v6 = vld [vmem:[#allocation6 + $0x110] sm:$0xff] }
 0x343   :  { %v3128_v13 = vpop.eup %3127  ;;  %v653_v15 = vadd.f32 1.0, %v3126_v5  ;;  %v1160_v5 = vld [vmem:[#allocation6 + $0x38] sm:$0xff]  ;;  %v1191_v7 = vld [vmem:[#allocation6 + $0x130] sm:$0xff] }
 0x344   :  { %v652_v22 = vadd.f32 1.0, %v3128_v13  ;;  %v1157_v13 = vld [vmem:[#allocation6 + $0x20] sm:$0xff] }
 0x345   :  { %3129 = vrcp.f32 %v653_v15  ;;  %v3682_v15 = vpack.c.bf16 %v1160_v5, %v1156_v10  ;;  %v3735_v10 = vpack.c.bf16 %v1191_v7, %v1187_v6  ;;  %v1194_v5 = vld [vmem:[#allocation6 + $0x148] sm:$0xff] }
 0x346   :  { %3131 = vpow2.f32 %v2402_v12  ;;  %v1153_v12 = vld [vmem:[#allocation6] sm:$0xff] }
 0x347   :  { %3133 = vrcp.f32 %v652_v22  ;;  %v3684_v22 = vpack.c.bf16 %v1157_v13, %v1153_v12  ;;  %v1198_v12 = vld [vmem:[#allocation6 + $0x168] sm:$0xff]  ;;  %v1196_v13 = vld [vmem:[#allocation6 + $0x158] sm:$0xff] }
 0x348   :  { %3135 = vrcp.f32 %v651_v24  ;;  %v1155_v24 = vld [vmem:[#allocation6 + $0x10] sm:$0xff] }
 0x34f   :  { %v3130_v29 = vpop.eup %3129 }
 0x350   :  { %v3132_v30 = vpop.eup %3131  ;;  %v663_v31 = vmul.f32 2.0, %v3130_v29  ;;  %v1159_v29 = vld [vmem:[#allocation6 + $0x30] sm:$0xff] }
 0x351   :  { %v3134_v33 = vpop.eup %3133  ;;  %v654_v44 = vadd.f32 1.0, %v3132_v30  ;;  %v3687_v30 = vpack.c.bf16 %v1159_v29, %v1155_v24  ;;  %v3739_v24 = vpack.c.bf16 %v1198_v12, %v1194_v5  ;;  %v1200_v29 = vld [vmem:[#allocation6 + $0x178] sm:$0xff] }
 0x352   :  { %v2403_v39 = vadd.f32 -1.0, %v663_v31  ;;  %v3136_v42 = vpop.eup %3135  ;;  %v665_v52 = vmul.f32 %v3134_v33, %v3592_v32  ;;  %v911_v32 = vld [vmem:[#allocation4 + $0x4] sm:$0x1]  ;;  %v1162_v31 = vld [vmem:[#allocation6 + $0x48] sm:$0xff] }
 0x353   :  { %3137 = vrcp.f32 %v654_v44  ;;  %v1166_v33 = vld [vmem:[#allocation6 + $0x68] sm:$0xff]  ;;  %v1168_v44 = vld [vmem:[#allocation6 + $0x78] sm:$0xff] }
 0x354   :  { %v666_v49 = vmul.f32 %v3136_v42, %v2403_v39  ;;  %v1164_v39 = vld [vmem:[#allocation6 + $0x58] sm:$0xff]  ;;  %v3692_v42 = vpack.c.bf16 %v1166_v33, %v1162_v31  ;;  %v1193_v31 = vld [vmem:[#allocation6 + $0x140] sm:$0xff] }
 0x355   :  { %v1197_v33 = vld [vmem:[#allocation6 + $0x160] sm:$0xff] }
 0x356   :  { %v3635_v51 = vadd.f32 %v666_v49, %v665_v52  ;;  %v1161_v49 = vld [vmem:[#allocation6 + $0x40] sm:$0xff] }
 0x357   :  { %v1165_v52 = vld [vmem:[#allocation6 + $0x60] sm:$0xff] }
 0x358   :  { %3139 = vtanh.f32 %v3635_v51 }
 0x35d   :  { %v3138_v16 = vpop.eup %3137 }
 0x362   :  { %v3140_v55 = vpop.eup %3139 }
 0x363   :  { %v669_v57 = vmul.f32 %v3140_v55, %v3138_v16  ;;  %v3696_v16 = vpack.c.bf16 %v1165_v52, %v1161_v49  ;;  %v1163_v55 = vld [vmem:[#allocation6 + $0x50] sm:$0xff] }
 0x364   :  { %v1195_v49 = vld [vmem:[#allocation6 + $0x150] sm:$0xff] }
 0x365   :  { %670 = vst [vmem:[#allocation2] sm:$0x1] %v669_v57  ;;  %v672_v59 = vadd.f32 %v671_v56, %v669_v57  ;;  %v1167_v56 = vld [vmem:[#allocation6 + $0x70] sm:$0xff] }
 0x366   :  { %v3699_v57 = vpack.c.bf16 %v1167_v56, %v1163_v55  ;;  %v1199_v52 = vld [vmem:[#allocation6 + $0x170] sm:$0xff]  ;;  %v1202_v55 = vld [vmem:[#allocation6 + $0x188] sm:$0xff] }
 0x367   :  { %802 = vmatmul.mubr.f32.vlgmr.msra.gmra.mrb[6].mxu0 %v672_v59  ;;  %873 = vmatmul.mubr.f32.vlgmr.msra.gmra.mrb[6].mxu1 %v672_v59  ;;  %v1170_v59 = vld [vmem:[#allocation6 + $0x88] sm:$0xff]  ;;  %v3747_v56 = vpack.c.bf16 %v1199_v52, %v1195_v49 }
 0x368   :  { %2701 = vmatpush1.bf16.msra.mxu0 %v3397_v14  ;;  %2733 = vmatpush1.bf16.msra.mxu1 %v3392_v9 }
 0x369   :  { %2703 = vmatprep.subr.bf16.mxu0 %v3406_v23  ;;  %2735 = vmatprep.subr.bf16.mxu1 %v3401_v18 }
 0x36a   :  { %1041 = vmatprep.mubr.f32.mxu0 %v3323_v1  ;;  %1112 = vmatprep.mubr.f32.mxu1 %v3323_v1 }
 0x36c   :  { %2705 = vmatpush1.bf16.msra.mxu0 %v3409_v27  ;;  %2737 = vmatpush1.bf16.msra.mxu1 %v3403_v19 }
 0x36d   :  { %2707 = vmatprep.subr.bf16.mxu0 %v3417_v36  ;;  %2739 = vmatprep.subr.bf16.mxu1 %v3411_v28 }
 0x370   :  { %2709 = vmatpush1.bf16.msra.mxu0 %v3421_v40  ;;  %2741 = vmatpush1.bf16.msra.mxu1 %v3415_v35 }
 0x371   :  { %2711 = vmatprep.subr.bf16.mxu0 %v3426_v45  ;;  %2743 = vmatprep.subr.bf16.mxu1 %v3423_v41 }
 0x374   :  { %2713 = vmatpush1.bf16.msra.mxu0 %v3433_v53  ;;  %2745 = vmatpush1.bf16.msra.mxu1 %v3429_v50 }
 0x375   :  { %2715 = vmatprep.subr.bf16.mxu0 %v3438_v58  ;;  %2747 = vmatprep.subr.bf16.mxu1 %v3435_v54 }
 0x378   :  { %2717 = vmatpush1.bf16.msra.mxu0 %v3445_v2  ;;  %2749 = vmatpush1.bf16.msra.mxu1 %v3441_v0 }
 0x379   :  { %2719 = vmatprep.subr.bf16.mxu0 %v3450_v8  ;;  %2751 = vmatprep.subr.bf16.mxu1 %v3447_v3 }
 0x37c   :  { %2721 = vmatpush1.bf16.msra.mxu0 %v3457_v20  ;;  %2753 = vmatpush1.bf16.msra.mxu1 %v3453_v17 }
 0x37d   :  { %2723 = vmatprep.subr.bf16.mxu0 %v3462_v26  ;;  %2755 = vmatprep.subr.bf16.mxu1 %v3459_v21 }
 0x380   :  { %2725 = vmatpush1.bf16.msra.mxu0 %v3469_v37  ;;  %2757 = vmatpush1.bf16.msra.mxu1 %v3465_v34 }
 0x381   :  { %2727 = vmatprep.subr.bf16.mxu0 %v3474_v43  ;;  %2759 = vmatprep.subr.bf16.mxu1 %v3471_v38 }
 0x384   :  { %2729 = vmatpush1.bf16.msra.mxu0 %v3481_v48  ;;  %2761 = vmatpush1.bf16.msra.mxu1 %v3477_v47 }
 0x385   :  { %2763 = vmatprep.subr.bf16.mxu0 %v3680_v11  ;;  %2795 = vmatprep.subr.bf16.mxu1 %v3682_v15 }
 0x43a   :  { %v803_v9 = vpop.f32.mrb[6].mxu0  ;;  %v874_v14 = vpop.f32.mrb[6].mxu1 }
 0x43b   :  { %v804_v18 = vadd.f32 %v803_v9, %v3527_v61  ;;  %v875_v19 = vadd.f32 %v874_v14, %v3525_v60  ;;  %v805_v23 = vpop.f32.mrb[7].mxu0  ;;  %v876_v27 = vpop.f32.mrb[7].mxu1  ;;  %v1174_v9 = vld [vmem:[#allocation6 + $0xa8] sm:$0xff]  ;;  %v1172_v14 = vld [vmem:[#allocation6 + $0x98] sm:$0xff] }
 0x43c   :  { %v806_v28 = vadd.f32 %v805_v23, %v3529_v62  ;;  %v877_v41 = vadd.f32 %v876_v27, %v3534_v25  ;;  %v1169_v23 = vld [vmem:[#allocation6 + $0x80] sm:$0xff] }
 0x43d   :  { %v2404_v35 = vmul.f32 -1.442695, %v804_v18  ;;  %v2406_v36 = vmul.f32 -1.442695, %v875_v19  ;;  %v3704_v18 = vpack.c.bf16 %v1174_v9, %v1170_v59  ;;  %v1176_v19 = vld [vmem:[#allocation6 + $0xb8] sm:$0xff]  ;;  %v1173_v27 = vld [vmem:[#allocation6 + $0xa0] sm:$0xff] }
 0x43e   :  { %v2405_v40 = vmul.f32 -1.442695, %v806_v28  ;;  %v2407_v53 = vmul.f32 -1.442695, %v877_v41  ;;  %v3706_v28 = vpack.c.bf16 %v1176_v19, %v1172_v14  ;;  %v1206_v59 = vld [vmem:[#allocation6 + $0x1a8] sm:$0xff]  ;;  %v1204_v9 = vld [vmem:[#allocation6 + $0x198] sm:$0xff] }
 0x43f   :  { %3141 = vpow2.f32 %v2404_v35  ;;  %v3708_v35 = vpack.c.bf16 %v1173_v27, %v1169_v23  ;;  %v1208_v14 = vld [vmem:[#allocation6 + $0x1b8] sm:$0xff]  ;;  %v3750_v19 = vpack.c.bf16 %v1206_v59, %v1202_v55  ;;  %v1201_v27 = vld [vmem:[#allocation6 + $0x180] sm:$0xff] }
 0x440   :  { %3143 = vpow2.f32 %v2406_v36  ;;  %v1171_v36 = vld [vmem:[#allocation6 + $0x90] sm:$0xff]  ;;  %v3752_v23 = vpack.c.bf16 %v1208_v14, %v1204_v9 }
 0x441   :  { %3145 = vpow2.f32 %v2405_v40  ;;  %v1175_v40 = vld [vmem:[#allocation6 + $0xb0] sm:$0xff] }
 0x442   :  { %v3711_v41 = vpack.c.bf16 %v1175_v40, %v1171_v36  ;;  %v1205_v36 = vld [vmem:[#allocation6 + $0x1a0] sm:$0xff]  ;;  %v1203_v40 = vld [vmem:[#allocation6 + $0x190] sm:$0xff] }
 0x449   :  { %v3142_v45 = vpop.eup %3141 }
 0x44a   :  { %v3144_v50 = vpop.eup %3143  ;;  %v891_v2 = vadd.f32 1.0, %v3142_v45  ;;  %v1178_v45 = vld [vmem:[#allocation6 + $0xc8] sm:$0xff] }
 0x44b   :  { %v3146_v54 = vpop.eup %3145  ;;  %v893_v58 = vadd.f32 1.0, %v3144_v50  ;;  %v1182_v50 = vld [vmem:[#allocation6 + $0xe8] sm:$0xff] }
 0x44c   :  { %v892_v0 = vadd.f32 1.0, %v3146_v54  ;;  %v3716_v54 = vpack.c.bf16 %v1182_v50, %v1178_v45  ;;  %v3755_v45 = vpack.c.bf16 %v1205_v36, %v1201_v27  ;;  %v1207_v50 = vld [vmem:[#allocation6 + $0x1b0] sm:$0xff] }
 0x44d   :  { %3147 = vrcp.f32 %v893_v58  ;;  %v1184_v58 = vld [vmem:[#allocation6 + $0xf8] sm:$0xff] }
 0x44e   :  { %3149 = vpow2.f32 %v2407_v53  ;;  %v1180_v53 = vld [vmem:[#allocation6 + $0xd8] sm:$0xff] }
 0x44f   :  { %3151 = vrcp.f32 %v892_v0  ;;  %v1177_v0 = vld [vmem:[#allocation6 + $0xc0] sm:$0xff] }
 0x450   :  { %3153 = vrcp.f32 %v891_v2  ;;  %v1181_v2 = vld [vmem:[#allocation6 + $0xe0] sm:$0xff] }
 0x457   :  { %v3148_v3 = vpop.eup %3147 }
 0x458   :  { %v3150_v8 = vpop.eup %3149  ;;  %v903_v17 = vmul.f32 2.0, %v3148_v3  ;;  %v3718_v3 = vpack.c.bf16 %v1184_v58, %v1180_v53  ;;  %v1210_v53 = vld [vmem:[#allocation6 + $0x1c8] sm:$0xff] }
 0x459   :  { %v3152_v20 = vpop.eup %3151  ;;  %v894_v34 = vadd.f32 1.0, %v3150_v8  ;;  %v3720_v8 = vpack.c.bf16 %v1181_v2, %v1177_v0  ;;  %v1214_v58 = vld [vmem:[#allocation6 + $0x1e8] sm:$0xff]  ;;  %v3759_v0 = vpack.c.bf16 %v1207_v50, %v1203_v40 }
 0x45a   :  { %v2408_v21 = vadd.f32 -1.0, %v903_v17  ;;  %v3154_v26 = vpop.eup %3153  ;;  %v905_v38 = vmul.f32 %v3152_v20, %v3635_v51  ;;  %v3694_v51 = vpack.c.bf16 %v1168_v44, %v1164_v39  ;;  %v1179_v17 = vld [vmem:[#allocation6 + $0xd0] sm:$0xff]  ;;  %v3742_v39 = vpack.c.bf16 %v1200_v29, %v1196_v13 }
 0x45b   :  { %3155 = vrcp.f32 %v894_v34  ;;  %v1183_v20 = vld [vmem:[#allocation6 + $0xf0] sm:$0xff]  ;;  %v1190_v34 = vld [vmem:[#allocation6 + $0x128] sm:$0xff]  ;;  %v3744_v44 = vpack.c.bf16 %v1197_v33, %v1193_v31  ;;  %v3761_v2 = vpack.c.bf16 %v1214_v58, %v1210_v53 }
 0x45c   :  { %v906_v37 = vmul.f32 %v3154_v26, %v2408_v21  ;;  %v3723_v21 = vpack.c.bf16 %v1183_v20, %v1179_v17  ;;  %v1186_v26 = vld [vmem:[#allocation6 + $0x108] sm:$0xff]  ;;  %v1212_v17 = vld [vmem:[#allocation6 + $0x1d8] sm:$0xff] }
 0x45d   :  { %v1216_v20 = vld [vmem:[#allocation6 + $0x1f8] sm:$0xff] }
 0x45e   :  { %v3675_v43 = vadd.f32 %v906_v37, %v905_v38  ;;  %v1188_v37 = vld [vmem:[#allocation6 + $0x118] sm:$0xff]  ;;  %v3728_v38 = vpack.c.bf16 %v1190_v34, %v1186_v26  ;;  %v1209_v26 = vld [vmem:[#allocation6 + $0x1c0] sm:$0xff]  ;;  %v3764_v34 = vpack.c.bf16 %v1216_v20, %v1212_v17 }
 0x460   :  { %3157 = vtanh.f32 %v3675_v43 }
 0x465   :  { %v3156_v47 = vpop.eup %3155 }
 0x46a   :  { %v3158_v48 = vpop.eup %3157 }
 0x46b   :  { %v909_v63 = vmul.f32 %v3158_v48, %v3156_v47  ;;  %v1192_v47 = vld [vmem:[#allocation6 + $0x138] sm:$0xff]  ;;  %v1185_v48 = vld [vmem:[#allocation6 + $0x100] sm:$0xff] }
 0x46d   :  { %910 = vst [vmem:[#allocation2 + $0x1] sm:$0x1] %v909_v63  ;;  %v912_v4 = vadd.f32 %v911_v32, %v909_v63  ;;  %v1189_v32 = vld [vmem:[#allocation6 + $0x120] sm:$0xff]  ;;  %v3730_v63 = vpack.c.bf16 %v1192_v47, %v1188_v37  ;;  %v1211_v47 = vld [vmem:[#allocation6 + $0x1d0] sm:$0xff] }
 0x46e   :  { %v1213_v37 = vld [vmem:[#allocation6 + $0x1e0] sm:$0xff] }
 0x46f   :  { %1042 = vmatmul.mubr.f32.vlgmr.msra.gmra.mrb[8].mxu0 %v912_v4  ;;  %1113 = vmatmul.mubr.f32.vlgmr.msra.gmra.mrb[8].mxu1 %v912_v4  ;;  %v3732_v4 = vpack.c.bf16 %v1189_v32, %v1185_v48  ;;  %v1215_v48 = vld [vmem:[#allocation6 + $0x1f0] sm:$0xff]  ;;  %v3767_v32 = vpack.c.bf16 %v1213_v37, %v1209_v26 }
 0x470   :  { %1281 = vmatprep.mubr.f32.mxu0 %v3323_v1  ;;  %1352 = vmatprep.mubr.f32.mxu1 %v3323_v1  ;;  %v3771_v6 = vpack.c.bf16 %v1215_v48, %v1211_v47 }
 0x471   :  { %2765 = vmatpush1.bf16.msra.mxu0 %v3684_v22  ;;  %2797 = vmatpush1.bf16.msra.mxu1 %v3687_v30 }
 0x472   :  { %2767 = vmatprep.subr.bf16.mxu0 %v3692_v42  ;;  %2799 = vmatprep.subr.bf16.mxu1 %v3694_v51 }
 0x475   :  { %2769 = vmatpush1.bf16.msra.mxu0 %v3696_v16  ;;  %2801 = vmatpush1.bf16.msra.mxu1 %v3699_v57 }
 0x476   :  { %2771 = vmatprep.subr.bf16.mxu0 %v3704_v18  ;;  %2803 = vmatprep.subr.bf16.mxu1 %v3706_v28 }
 0x479   :  { %2773 = vmatpush1.bf16.msra.mxu0 %v3708_v35  ;;  %2805 = vmatpush1.bf16.msra.mxu1 %v3711_v41 }
 0x47a   :  { %2775 = vmatprep.subr.bf16.mxu0 %v3716_v54  ;;  %2807 = vmatprep.subr.bf16.mxu1 %v3718_v3 }
 0x47d   :  { %2777 = vmatpush1.bf16.msra.mxu0 %v3720_v8  ;;  %2809 = vmatpush1.bf16.msra.mxu1 %v3723_v21 }
 0x47e   :  { %2779 = vmatprep.subr.bf16.mxu0 %v3728_v38  ;;  %2811 = vmatprep.subr.bf16.mxu1 %v3730_v63 }
 0x481   :  { %2781 = vmatpush1.bf16.msra.mxu0 %v3732_v4  ;;  %2813 = vmatpush1.bf16.msra.mxu1 %v3735_v10 }
 0x482   :  { %2783 = vmatprep.subr.bf16.mxu0 %v3739_v24  ;;  %2815 = vmatprep.subr.bf16.mxu1 %v3742_v39 }
 0x485   :  { %2785 = vmatpush1.bf16.msra.mxu0 %v3744_v44  ;;  %2817 = vmatpush1.bf16.msra.mxu1 %v3747_v56 }
 0x486   :  { %2787 = vmatprep.subr.bf16.mxu0 %v3750_v19  ;;  %2819 = vmatprep.subr.bf16.mxu1 %v3752_v23 }
 0x489   :  { %2789 = vmatpush1.bf16.msra.mxu0 %v3755_v45  ;;  %2821 = vmatpush1.bf16.msra.mxu1 %v3759_v0 }
 0x48a   :  { %2791 = vmatprep.subr.bf16.mxu0 %v3761_v2  ;;  %2823 = vmatprep.subr.bf16.mxu1 %v3764_v34 }
 0x48d   :  { %2793 = vmatpush1.bf16.msra.mxu0 %v3767_v32  ;;  %2825 = vmatpush1.bf16.msra.mxu1 %v3771_v6 }
 0x48e   :  { %2827 = vmatprep.subr.bf16.mxu0 %v3680_v11  ;;  %2859 = vmatprep.subr.bf16.mxu1 %v3682_v15 }
 0x542   :  { %v1043_v7 = vpop.f32.mrb[8].mxu0  ;;  %v1114_v5 = vpop.f32.mrb[8].mxu1 }
 0x543   :  { %v1044_v12 = vadd.f32 %v1043_v7, %v3527_v61  ;;  %v1115_v13 = vadd.f32 %v1114_v5, %v3525_v60  ;;  %v1045_v29 = vpop.f32.mrb[9].mxu0  ;;  %v1116_v31 = vpop.f32.mrb[9].mxu1 }
 0x544   :  { %v1046_v33 = vadd.f32 %v1045_v29, %v3529_v62  ;;  %v1117_v59 = vadd.f32 %v1116_v31, %v3534_v25  ;;  %v1151_v31 = vld [vmem:[#allocation4 + $0x5] sm:$0x1] }
 0x545   :  { %v2409_v49 = vmul.f32 -1.442695, %v1044_v12  ;;  %v2411_v52 = vmul.f32 -1.442695, %v1115_v13 }
 0x546   :  { %v2410_v55 = vmul.f32 -1.442695, %v1046_v33  ;;  %v2412_v27 = vmul.f32 -1.442695, %v1117_v59 }
 0x547   :  { %3159 = vpow2.f32 %v2409_v49 }
 0x548   :  { %3161 = vpow2.f32 %v2411_v52 }
 0x549   :  { %3163 = vpow2.f32 %v2410_v55 }
 0x551   :  { %v3160_v9 = vpop.eup %3159 }
 0x552   :  { %v3162_v14 = vpop.eup %3161  ;;  %v1131_v53 = vadd.f32 1.0, %v3160_v9 }
 0x553   :  { %v3164_v36 = vpop.eup %3163  ;;  %v1133_v40 = vadd.f32 1.0, %v3162_v14 }
 0x554   :  { %v1132_v50 = vadd.f32 1.0, %v3164_v36 }
 0x555   :  { %3165 = vrcp.f32 %v1133_v40 }
 0x556   :  { %3167 = vpow2.f32 %v2412_v27 }
 0x557   :  { %3169 = vrcp.f32 %v1132_v50 }
 0x558   :  { %3171 = vrcp.f32 %v1131_v53 }
 0x55f   :  { %v3166_v58 = vpop.eup %3165 }
 0x560   :  { %v3168_v17 = vpop.eup %3167  ;;  %v1143_v20 = vmul.f32 2.0, %v3166_v58 }
 0x561   :  { %v3170_v26 = vpop.eup %3169  ;;  %v1134_v48 = vadd.f32 1.0, %v3168_v17 }
 0x562   :  { %v2413_v37 = vadd.f32 -1.0, %v1143_v20  ;;  %v3172_v47 = vpop.eup %3171  ;;  %v1145_v5 = vmul.f32 %v3170_v26, %v3675_v43 }
 0x563   :  { %3173 = vrcp.f32 %v1134_v48 }
 0x564   :  { %v1146_v7 = vmul.f32 %v3172_v47, %v2413_v37 }
 0x566   :  { %v3783_v12 = vadd.f32 %v1146_v7, %v1145_v5 }
 0x568   :  { %3175 = vtanh.f32 %v3783_v12 }
 0x56d   :  { %v3174_v13 = vpop.eup %3173 }
 0x572   :  { %v3176_v29 = vpop.eup %3175 }
 0x573   :  { %v1149_v33 = vmul.f32 %v3176_v29, %v3174_v13 }
 0x575   :  { %1150 = vst [vmem:[#allocation2 + $0x2] sm:$0x1] %v1149_v33  ;;  %v1152_v49 = vadd.f32 %v1151_v31, %v1149_v33 }
 0x577   :  { %1282 = vmatmul.mubr.f32.vlgmr.msra.gmra.mrb[10].mxu0 %v1152_v49  ;;  %1353 = vmatmul.mubr.f32.vlgmr.msra.gmra.mrb[10].mxu1 %v1152_v49 }
 0x578   :  { %2829 = vmatpush1.bf16.msra.mxu0 %v3684_v22  ;;  %2861 = vmatpush1.bf16.msra.mxu1 %v3687_v30 }
 0x579   :  { %2831 = vmatprep.subr.bf16.mxu0 %v3692_v42  ;;  %2863 = vmatprep.subr.bf16.mxu1 %v3694_v51 }
 0x57a   :  { %1521 = vmatprep.mubr.f32.mxu0 %v3323_v1  ;;  %1592 = vmatprep.mubr.f32.mxu1 %v3323_v1 }
 0x57c   :  { %2833 = vmatpush1.bf16.msra.mxu0 %v3696_v16  ;;  %2865 = vmatpush1.bf16.msra.mxu1 %v3699_v57 }
 0x57d   :  { %2835 = vmatprep.subr.bf16.mxu0 %v3704_v18  ;;  %2867 = vmatprep.subr.bf16.mxu1 %v3706_v28 }
 0x580   :  { %2837 = vmatpush1.bf16.msra.mxu0 %v3708_v35  ;;  %2869 = vmatpush1.bf16.msra.mxu1 %v3711_v41 }
 0x581   :  { %2839 = vmatprep.subr.bf16.mxu0 %v3716_v54  ;;  %2871 = vmatprep.subr.bf16.mxu1 %v3718_v3 }
 0x584   :  { %2841 = vmatpush1.bf16.msra.mxu0 %v3720_v8  ;;  %2873 = vmatpush1.bf16.msra.mxu1 %v3723_v21 }
 0x585   :  { %2843 = vmatprep.subr.bf16.mxu0 %v3728_v38  ;;  %2875 = vmatprep.subr.bf16.mxu1 %v3730_v63 }
 0x588   :  { %2845 = vmatpush1.bf16.msra.mxu0 %v3732_v4  ;;  %2877 = vmatpush1.bf16.msra.mxu1 %v3735_v10 }
 0x589   :  { %2847 = vmatprep.subr.bf16.mxu0 %v3739_v24  ;;  %2879 = vmatprep.subr.bf16.mxu1 %v3742_v39 }
 0x58c   :  { %2849 = vmatpush1.bf16.msra.mxu0 %v3744_v44  ;;  %2881 = vmatpush1.bf16.msra.mxu1 %v3747_v56 }
 0x58d   :  { %2851 = vmatprep.subr.bf16.mxu0 %v3750_v19  ;;  %2883 = vmatprep.subr.bf16.mxu1 %v3752_v23 }
 0x590   :  { %2853 = vmatpush1.bf16.msra.mxu0 %v3755_v45  ;;  %2885 = vmatpush1.bf16.msra.mxu1 %v3759_v0 }
 0x591   :  { %2855 = vmatprep.subr.bf16.mxu0 %v3761_v2  ;;  %2887 = vmatprep.subr.bf16.mxu1 %v3764_v34 }
 0x594   :  { %2857 = vmatpush1.bf16.msra.mxu0 %v3767_v32  ;;  %2889 = vmatpush1.bf16.msra.mxu1 %v3771_v6 }
 0x595   :  { %2891 = vmatprep.subr.bf16.mxu0 %v3680_v11  ;;  %2923 = vmatprep.subr.bf16.mxu1 %v3682_v15 }
 0x64a   :  { %v1283_v43 = vpop.f32.mrb[10].mxu0  ;;  %v1354_v52 = vpop.f32.mrb[10].mxu1 }
 0x64b   :  { %v1284_v55 = vadd.f32 %v1283_v43, %v3527_v61  ;;  %v1355_v59 = vadd.f32 %v1354_v52, %v3525_v60  ;;  %v1285_v9 = vpop.f32.mrb[11].mxu0  ;;  %v1356_v14 = vpop.f32.mrb[11].mxu1 }
 0x64c   :  { %v1286_v27 = vadd.f32 %v1285_v9, %v3529_v62  ;;  %v1357_v53 = vadd.f32 %v1356_v14, %v3534_v25  ;;  %v1391_v14 = vld [vmem:[#allocation4 + $0x6] sm:$0x1] }
 0x64d   :  { %v2414_v36 = vmul.f32 -1.442695, %v1284_v55  ;;  %v2416_v40 = vmul.f32 -1.442695, %v1355_v59 }
 0x64e   :  { %v2415_v50 = vmul.f32 -1.442695, %v1286_v27  ;;  %v2417_v20 = vmul.f32 -1.442695, %v1357_v53 }
 0x64f   :  { %3177 = vpow2.f32 %v2414_v36 }
 0x650   :  { %3179 = vpow2.f32 %v2416_v40 }
 0x651   :  { %3181 = vpow2.f32 %v2415_v50 }
 0x659   :  { %v3178_v58 = vpop.eup %3177 }
 0x65a   :  { %v3180_v17 = vpop.eup %3179  ;;  %v1371_v48 = vadd.f32 1.0, %v3178_v58 }
 0x65b   :  { %v3182_v26 = vpop.eup %3181  ;;  %v1373_v37 = vadd.f32 1.0, %v3180_v17 }
 0x65c   :  { %v1372_v47 = vadd.f32 1.0, %v3182_v26 }
 0x65d   :  { %3183 = vrcp.f32 %v1373_v37 }
 0x65e   :  { %3185 = vpow2.f32 %v2417_v20 }
 0x65f   :  { %3187 = vrcp.f32 %v1372_v47 }
 0x660   :  { %3189 = vrcp.f32 %v1371_v48 }
 0x667   :  { %v3184_v7 = vpop.eup %3183 }
 0x668   :  { %v3186_v5 = vpop.eup %3185  ;;  %v1383_v13 = vmul.f32 2.0, %v3184_v7 }
 0x669   :  { %v3188_v29 = vpop.eup %3187  ;;  %v1374_v49 = vadd.f32 1.0, %v3186_v5 }
 0x66a   :  { %v2418_v31 = vadd.f32 -1.0, %v1383_v13  ;;  %v3190_v33 = vpop.eup %3189  ;;  %v1385_v52 = vmul.f32 %v3188_v29, %v3783_v12 }
 0x66b   :  { %3191 = vrcp.f32 %v1374_v49 }
 0x66c   :  { %v1386_v43 = vmul.f32 %v3190_v33, %v2418_v31 }
 0x66e   :  { %v3825_v55 = vadd.f32 %v1386_v43, %v1385_v52 }
 0x670   :  { %3193 = vtanh.f32 %v3825_v55 }
 0x675   :  { %v3192_v59 = vpop.eup %3191 }
 0x67a   :  { %v3194_v9 = vpop.eup %3193 }
 0x67b   :  { %v1389_v27 = vmul.f32 %v3194_v9, %v3192_v59 }
 0x67d   :  { %1390 = vst [vmem:[#allocation2 + $0x3] sm:$0x1] %v1389_v27  ;;  %v1392_v36 = vadd.f32 %v1391_v14, %v1389_v27 }
 0x67f   :  { %1522 = vmatmul.mubr.f32.vlgmr.msra.gmra.mrb[12].mxu0 %v1392_v36  ;;  %1593 = vmatmul.mubr.f32.vlgmr.msra.gmra.mrb[12].mxu1 %v1392_v36 }
 0x680   :  { %2893 = vmatpush1.bf16.msra.mxu0 %v3684_v22  ;;  %2925 = vmatpush1.bf16.msra.mxu1 %v3687_v30 }
 0x681   :  { %2895 = vmatprep.subr.bf16.mxu0 %v3692_v42  ;;  %2927 = vmatprep.subr.bf16.mxu1 %v3694_v51 }
 0x682   :  { %1761 = vmatprep.mubr.f32.mxu0 %v3323_v1  ;;  %1832 = vmatprep.mubr.f32.mxu1 %v3323_v1 }
 0x684   :  { %2897 = vmatpush1.bf16.msra.mxu0 %v3696_v16  ;;  %2929 = vmatpush1.bf16.msra.mxu1 %v3699_v57 }
 0x685   :  { %2899 = vmatprep.subr.bf16.mxu0 %v3704_v18  ;;  %2931 = vmatprep.subr.bf16.mxu1 %v3706_v28 }
 0x688   :  { %2901 = vmatpush1.bf16.msra.mxu0 %v3708_v35  ;;  %2933 = vmatpush1.bf16.msra.mxu1 %v3711_v41 }
 0x689   :  { %2903 = vmatprep.subr.bf16.mxu0 %v3716_v54  ;;  %2935 = vmatprep.subr.bf16.mxu1 %v3718_v3 }
 0x68c   :  { %2905 = vmatpush1.bf16.msra.mxu0 %v3720_v8  ;;  %2937 = vmatpush1.bf16.msra.mxu1 %v3723_v21 }
 0x68d   :  { %2907 = vmatprep.subr.bf16.mxu0 %v3728_v38  ;;  %2939 = vmatprep.subr.bf16.mxu1 %v3730_v63 }
 0x690   :  { %2909 = vmatpush1.bf16.msra.mxu0 %v3732_v4  ;;  %2941 = vmatpush1.bf16.msra.mxu1 %v3735_v10 }
 0x691   :  { %2911 = vmatprep.subr.bf16.mxu0 %v3739_v24  ;;  %2943 = vmatprep.subr.bf16.mxu1 %v3742_v39 }
 0x694   :  { %2913 = vmatpush1.bf16.msra.mxu0 %v3744_v44  ;;  %2945 = vmatpush1.bf16.msra.mxu1 %v3747_v56 }
 0x695   :  { %2915 = vmatprep.subr.bf16.mxu0 %v3750_v19  ;;  %2947 = vmatprep.subr.bf16.mxu1 %v3752_v23 }
 0x698   :  { %2917 = vmatpush1.bf16.msra.mxu0 %v3755_v45  ;;  %2949 = vmatpush1.bf16.msra.mxu1 %v3759_v0 }
 0x699   :  { %2919 = vmatprep.subr.bf16.mxu0 %v3761_v2  ;;  %2951 = vmatprep.subr.bf16.mxu1 %v3764_v34 }
 0x69c   :  { %2921 = vmatpush1.bf16.msra.mxu0 %v3767_v32  ;;  %2953 = vmatpush1.bf16.msra.mxu1 %v3771_v6 }
 0x69d   :  { %2955 = vmatprep.subr.bf16.mxu0 %v3680_v11  ;;  %2987 = vmatprep.subr.bf16.mxu1 %v3682_v15 }
 0x752   :  { %v1523_v12 = vpop.f32.mrb[12].mxu0  ;;  %v1594_v40 = vpop.f32.mrb[12].mxu1 }
 0x753   :  { %v1524_v50 = vadd.f32 %v1523_v12, %v3527_v61  ;;  %v1595_v53 = vadd.f32 %v1594_v40, %v3525_v60  ;;  %v1525_v58 = vpop.f32.mrb[13].mxu0  ;;  %v1596_v17 = vpop.f32.mrb[13].mxu1 }
 0x754   :  { %v1526_v20 = vadd.f32 %v1525_v58, %v3529_v62  ;;  %v1597_v11 = vadd.f32 %v1596_v17, %v3534_v25 }
 0x755   :  { %v2419_v26 = vmul.f32 -1.442695, %v1524_v50  ;;  %v2421_v37 = vmul.f32 -1.442695, %v1595_v53  ;;  %v1631_v53 = vld [vmem:[#allocation4 + $0x7] sm:$0x1] }
 0x756   :  { %v2420_v47 = vmul.f32 -1.442695, %v1526_v20  ;;  %v2422_v7 = vmul.f32 -1.442695, %v1597_v11  ;;  %v2115_v20 = vld [vmem:[#allocation6 + $0x8] sm:$0xff]  ;;  %v2121_v11 = vld [vmem:[#allocation6 + $0x38] sm:$0xff] }
 0x757   :  { %3195 = vpow2.f32 %v2419_v26  ;;  %v2119_v26 = vld [vmem:[#allocation6 + $0x28] sm:$0xff] }
 0x758   :  { %3197 = vpow2.f32 %v2421_v37  ;;  %v2117_v37 = vld [vmem:[#allocation6 + $0x18] sm:$0xff] }
 0x759   :  { %3199 = vpow2.f32 %v2420_v47  ;;  %v3018_v47 = vpack.c.bf16 %v2119_v26, %v2115_v20  ;;  %v2148_v20 = vld [vmem:[#allocation6 + $0x110] sm:$0xff] }
 0x75a   :  { %v2152_v26 = vld [vmem:[#allocation6 + $0x130] sm:$0xff] }
 0x761   :  { %v3196_v48 = vpop.eup %3195 }
 0x762   :  { %v3198_v15 = vpop.eup %3197  ;;  %v1611_v31 = vadd.f32 1.0, %v3196_v48  ;;  %v2114_v48 = vld [vmem:[#allocation6] sm:$0xff] }
 0x763   :  { %v3200_v5 = vpop.eup %3199  ;;  %v1613_v13 = vadd.f32 1.0, %v3198_v15  ;;  %v2118_v15 = vld [vmem:[#allocation6 + $0x20] sm:$0xff] }
 0x764   :  { %v1612_v29 = vadd.f32 1.0, %v3200_v5  ;;  %v3020_v5 = vpack.c.bf16 %v2118_v15, %v2114_v48  ;;  %v2157_v48 = vld [vmem:[#allocation6 + $0x158] sm:$0xff] }
 0x765   :  { %3201 = vrcp.f32 %v1613_v13  ;;  %v2116_v13 = vld [vmem:[#allocation6 + $0x10] sm:$0xff]  ;;  %v2161_v15 = vld [vmem:[#allocation6 + $0x178] sm:$0xff] }
 0x766   :  { %3203 = vpow2.f32 %v2422_v7  ;;  %v3050_v7 = vpack.c.bf16 %v2121_v11, %v2117_v37  ;;  %v2155_v37 = vld [vmem:[#allocation6 + $0x148] sm:$0xff] }
 0x767   :  { %3205 = vrcp.f32 %v1612_v29  ;;  %v2120_v29 = vld [vmem:[#allocation6 + $0x30] sm:$0xff]  ;;  %v2159_v11 = vld [vmem:[#allocation6 + $0x168] sm:$0xff] }
 0x768   :  { %3207 = vrcp.f32 %v1611_v31  ;;  %v3052_v31 = vpack.c.bf16 %v2120_v29, %v2116_v13  ;;  %v2154_v13 = vld [vmem:[#allocation6 + $0x140] sm:$0xff] }
 0x769   :  { %v2158_v29 = vld [vmem:[#allocation6 + $0x160] sm:$0xff] }
 0x76f   :  { %v3202_v33 = vpop.eup %3201 }
 0x770   :  { %v3204_v49 = vpop.eup %3203  ;;  %v1623_v43 = vmul.f32 2.0, %v3202_v33  ;;  %v2123_v33 = vld [vmem:[#allocation6 + $0x48] sm:$0xff] }
 0x771   :  { %v3206_v52 = vpop.eup %3205  ;;  %v1614_v14 = vadd.f32 1.0, %v3204_v49  ;;  %v2127_v49 = vld [vmem:[#allocation6 + $0x68] sm:$0xff] }
 0x772   :  { %v2423_v59 = vadd.f32 -1.0, %v1623_v43  ;;  %v3208_v9 = vpop.eup %3207  ;;  %v1625_v36 = vmul.f32 %v3206_v52, %v3825_v55  ;;  %v2125_v43 = vld [vmem:[#allocation6 + $0x58] sm:$0xff] }
 0x773   :  { %3209 = vrcp.f32 %v1614_v14  ;;  %v2129_v52 = vld [vmem:[#allocation6 + $0x78] sm:$0xff] }
 0x774   :  { %v1626_v27 = vmul.f32 %v3208_v9, %v2423_v59  ;;  %v2122_v59 = vld [vmem:[#allocation6 + $0x40] sm:$0xff]  ;;  %v3054_v14 = vpack.c.bf16 %v2129_v52, %v2125_v43  ;;  %v2163_v43 = vld [vmem:[#allocation6 + $0x188] sm:$0xff] }
 0x775   :  { %v2126_v9 = vld [vmem:[#allocation6 + $0x60] sm:$0xff] }
 0x776   :  { %v3867_v12 = vadd.f32 %v1626_v27, %v1625_v36  ;;  %v3024_v27 = vpack.c.bf16 %v2126_v9, %v2122_v59  ;;  %v2124_v36 = vld [vmem:[#allocation6 + $0x50] sm:$0xff]  ;;  %v2165_v9 = vld [vmem:[#allocation6 + $0x198] sm:$0xff] }
 0x778   :  { %3211 = vtanh.f32 %v3867_v12 }
 0x77d   :  { %v3210_v40 = vpop.eup %3209 }
 0x782   :  { %v3212_v50 = vpop.eup %3211 }
 0x783   :  { %v1629_v58 = vmul.f32 %v3212_v50, %v3210_v40  ;;  %v2131_v50 = vld [vmem:[#allocation6 + $0x88] sm:$0xff] }
 0x785   :  { %1630 = vst [vmem:[#allocation2 + $0x4] sm:$0x1] %v1629_v58  ;;  %v1632_v17 = vadd.f32 %v1631_v53, %v1629_v58  ;;  %v2135_v53 = vld [vmem:[#allocation6 + $0xa8] sm:$0xff]  ;;  %v2133_v58 = vld [vmem:[#allocation6 + $0x98] sm:$0xff] }
 0x787   :  { %1762 = vmatmul.mubr.f32.vlgmr.msra.gmra.mrb[14].mxu0 %v1632_v17  ;;  %1833 = vmatmul.mubr.f32.vlgmr.msra.gmra.mrb[14].mxu1 %v1632_v17  ;;  %v3026_v17 = vpack.c.bf16 %v2135_v53, %v2131_v50  ;;  %v2168_v50 = vld [vmem:[#allocation6 + $0x1b0] sm:$0xff]  ;;  %v2171_v53 = vld [vmem:[#allocation6 + $0x1c8] sm:$0xff] }
 0x788   :  { %2957 = vmatpush1.bf16.msra.mxu0 %v3684_v22  ;;  %2989 = vmatpush1.bf16.msra.mxu1 %v3687_v30 }
 0x789   :  { %2959 = vmatprep.subr.bf16.mxu0 %v3692_v42  ;;  %2991 = vmatprep.subr.bf16.mxu1 %v3694_v51 }
 0x78a   :  { %1999 = vmatprep.mubr.f32.mxu0 %v3323_v1  ;;  %2070 = vmatprep.mubr.f32.mxu1 %v3323_v1 }
 0x78c   :  { %2961 = vmatpush1.bf16.msra.mxu0 %v3696_v16  ;;  %2993 = vmatpush1.bf16.msra.mxu1 %v3699_v57 }
 0x78d   :  { %2963 = vmatprep.subr.bf16.mxu0 %v3704_v18  ;;  %2995 = vmatprep.subr.bf16.mxu1 %v3706_v28 }
 0x790   :  { %2965 = vmatpush1.bf16.msra.mxu0 %v3708_v35  ;;  %2997 = vmatpush1.bf16.msra.mxu1 %v3711_v41 }
 0x791   :  { %2967 = vmatprep.subr.bf16.mxu0 %v3716_v54  ;;  %2999 = vmatprep.subr.bf16.mxu1 %v3718_v3 }
 0x794   :  { %2969 = vmatpush1.bf16.msra.mxu0 %v3720_v8  ;;  %3001 = vmatpush1.bf16.msra.mxu1 %v3723_v21 }
 0x795   :  { %2971 = vmatprep.subr.bf16.mxu0 %v3728_v38  ;;  %3003 = vmatprep.subr.bf16.mxu1 %v3730_v63 }
 0x798   :  { %2973 = vmatpush1.bf16.msra.mxu0 %v3732_v4  ;;  %3005 = vmatpush1.bf16.msra.mxu1 %v3735_v10 }
 0x799   :  { %2975 = vmatprep.subr.bf16.mxu0 %v3739_v24  ;;  %3007 = vmatprep.subr.bf16.mxu1 %v3742_v39 }
 0x79c   :  { %2977 = vmatpush1.bf16.msra.mxu0 %v3744_v44  ;;  %3009 = vmatpush1.bf16.msra.mxu1 %v3747_v56 }
 0x79d   :  { %2979 = vmatprep.subr.bf16.mxu0 %v3750_v19  ;;  %3011 = vmatprep.subr.bf16.mxu1 %v3752_v23 }
 0x7a0   :  { %2981 = vmatpush1.bf16.msra.mxu0 %v3755_v45  ;;  %3013 = vmatpush1.bf16.msra.mxu1 %v3759_v0 }
 0x7a1   :  { %2983 = vmatprep.subr.bf16.mxu0 %v3761_v2  ;;  %3015 = vmatprep.subr.bf16.mxu1 %v3764_v34 }
 0x7a4   :  { %2985 = vmatpush1.bf16.msra.mxu0 %v3767_v32  ;;  %3017 = vmatpush1.bf16.msra.mxu1 %v3771_v6 }
 0x7a5   :  { %3019 = vmatprep.subr.bf16.mxu0 %v3018_v47  ;;  %3051 = vmatprep.subr.bf16.mxu1 %v3050_v7  ;;  %v3068_v47 = vpack.c.bf16 %v2152_v26, %v2148_v20  ;;  %v3038_v7 = vpack.c.bf16 %v2159_v11, %v2155_v37 }
 0x85a   :  { %v1763_v22 = vpop.f32.mrb[14].mxu0  ;;  %v1834_v30 = vpop.f32.mrb[14].mxu1 }
 0x85b   :  { %v1764_v42 = vadd.f32 %v1763_v22, %v3527_v61  ;;  %v1835_v51 = vadd.f32 %v1834_v30, %v3525_v60  ;;  %v1765_v16 = vpop.f32.mrb[15].mxu0  ;;  %v1836_v57 = vpop.f32.mrb[15].mxu1  ;;  %v2137_v22 = vld [vmem:[#allocation6 + $0xb8] sm:$0xff]  ;;  %v2130_v30 = vld [vmem:[#allocation6 + $0x80] sm:$0xff] }
 0x85c   :  { %v1766_v18 = vadd.f32 %v1765_v16, %v3529_v62  ;;  %v1837_v54 = vadd.f32 %v1836_v57, %v3534_v25  ;;  %v2132_v57 = vld [vmem:[#allocation6 + $0x90] sm:$0xff] }
 0x85d   :  { %v2424_v28 = vmul.f32 -1.442695, %v1764_v42  ;;  %v2426_v35 = vmul.f32 -1.442695, %v1835_v51  ;;  %v2134_v42 = vld [vmem:[#allocation6 + $0xa0] sm:$0xff]  ;;  %v3058_v51 = vpack.c.bf16 %v2137_v22, %v2133_v58  ;;  %v2175_v58 = vld [vmem:[#allocation6 + $0x1e8] sm:$0xff] }
 0x85e   :  { %v2425_v41 = vmul.f32 -1.442695, %v1766_v18  ;;  %v2427_v21 = vmul.f32 -1.442695, %v1837_v54  ;;  %v3028_v16 = vpack.c.bf16 %v2134_v42, %v2130_v30  ;;  %v2136_v18 = vld [vmem:[#allocation6 + $0xb0] sm:$0xff]  ;;  %v2141_v54 = vld [vmem:[#allocation6 + $0xd8] sm:$0xff] }
 0x85f   :  { %3213 = vpow2.f32 %v2424_v28  ;;  %v3060_v28 = vpack.c.bf16 %v2136_v18, %v2132_v57  ;;  %v2177_v30 = vld [vmem:[#allocation6 + $0x1f8] sm:$0xff]  ;;  %v2174_v57 = vld [vmem:[#allocation6 + $0x1e0] sm:$0xff] }
 0x860   :  { %3215 = vpow2.f32 %v2426_v35  ;;  %v2139_v35 = vld [vmem:[#allocation6 + $0xc8] sm:$0xff] }
 0x861   :  { %3217 = vpow2.f32 %v2425_v41  ;;  %v2143_v41 = vld [vmem:[#allocation6 + $0xe8] sm:$0xff] }
 0x869   :  { %v3214_v3 = vpop.eup %3213 }
 0x86a   :  { %v3216_v8 = vpop.eup %3215  ;;  %v1851_v10 = vadd.f32 1.0, %v3214_v3  ;;  %v3030_v3 = vpack.c.bf16 %v2143_v41, %v2139_v35  ;;  %v2176_v35 = vld [vmem:[#allocation6 + $0x1f0] sm:$0xff] }
 0x86b   :  { %v3218_v38 = vpop.eup %3217  ;;  %v1853_v63 = vadd.f32 1.0, %v3216_v8  ;;  %v2145_v8 = vld [vmem:[#allocation6 + $0xf8] sm:$0xff] }
 0x86c   :  { %v1852_v4 = vadd.f32 1.0, %v3218_v38  ;;  %v2142_v38 = vld [vmem:[#allocation6 + $0xe0] sm:$0xff] }
 0x86d   :  { %3219 = vrcp.f32 %v1853_v63  ;;  %v3062_v63 = vpack.c.bf16 %v2145_v8, %v2141_v54 }
 0x86e   :  { %3221 = vpow2.f32 %v2427_v21  ;;  %v2138_v21 = vld [vmem:[#allocation6 + $0xc0] sm:$0xff] }
 0x86f   :  { %3223 = vrcp.f32 %v1852_v4  ;;  %v3032_v4 = vpack.c.bf16 %v2142_v38, %v2138_v21 }
 0x870   :  { %3225 = vrcp.f32 %v1851_v10  ;;  %v2140_v10 = vld [vmem:[#allocation6 + $0xd0] sm:$0xff] }
 0x877   :  { %v3220_v24 = vpop.eup %3219 }
 0x878   :  { %v3222_v39 = vpop.eup %3221  ;;  %v1863_v44 = vmul.f32 2.0, %v3220_v24  ;;  %v2144_v24 = vld [vmem:[#allocation6 + $0xf0] sm:$0xff] }
 0x879   :  { %v3224_v56 = vpop.eup %3223  ;;  %v1854_v45 = vadd.f32 1.0, %v3222_v39  ;;  %v3064_v39 = vpack.c.bf16 %v2144_v24, %v2140_v10 }
 0x87a   :  { %v2428_v19 = vadd.f32 -1.0, %v1863_v44  ;;  %v3226_v23 = vpop.eup %3225  ;;  %v1865_v2 = vmul.f32 %v3224_v56, %v3867_v12  ;;  %v2128_v12 = vld [vmem:[#allocation6 + $0x70] sm:$0xff]  ;;  %v2147_v44 = vld [vmem:[#allocation6 + $0x108] sm:$0xff] }
 0x87b   :  { %3227 = vrcp.f32 %v1854_v45  ;;  %v3056_v40 = vpack.c.bf16 %v2128_v12, %v2124_v36  ;;  %v2151_v56 = vld [vmem:[#allocation6 + $0x128] sm:$0xff]  ;;  %v2153_v45 = vld [vmem:[#allocation6 + $0x138] sm:$0xff]  ;;  %v2166_v12 = vld [vmem:[#allocation6 + $0x1a0] sm:$0xff] }
 0x87c   :  { %v1866_v0 = vmul.f32 %v3226_v23, %v2428_v19  ;;  %v2149_v19 = vld [vmem:[#allocation6 + $0x118] sm:$0xff]  ;;  %v3034_v23 = vpack.c.bf16 %v2151_v56, %v2147_v44 }
 0x87e   :  { %v3907_v34 = vadd.f32 %v1866_v0, %v1865_v2  ;;  %v2146_v0 = vld [vmem:[#allocation6 + $0x100] sm:$0xff] }
 0x87f   :  { %v2150_v2 = vld [vmem:[#allocation6 + $0x120] sm:$0xff] }
 0x880   :  { %3229 = vtanh.f32 %v3907_v34 }
 0x885   :  { %v3228_v32 = vpop.eup %3227 }
 0x88a   :  { %v3230_v6 = vpop.eup %3229 }
 0x88b   :  { %v3910_v55 = vmul.f32 %v3230_v6, %v3228_v32  ;;  %v3066_v32 = vpack.c.bf16 %v2153_v45, %v2149_v19  ;;  %v3036_v6 = vpack.c.bf16 %v2150_v2, %v2146_v0 }
 0x88d   :  { %1870 = vst [vmem:[#allocation2 + $0x5] sm:$0x1] %v3910_v55  ;;  %2000 = vmatmul.mubr.f32.vlgmr.msra.gmra.mrb[16].mxu0 %v3910_v55  ;;  %2071 = vmatmul.mubr.f32.vlgmr.msra.gmra.mrb[16].mxu1 %v3910_v55 }
 0x88e   :  { %2242 = vmatprep.mubr.f32.mxu0 %v3323_v1  ;;  %2313 = vmatprep.mubr.f32.mxu1 %v3323_v1  ;;  %v3022_v1 = vpack.c.bf16 %v2127_v49, %v2123_v33  ;;  %v3040_v33 = vpack.c.bf16 %v2158_v29, %v2154_v13  ;;  %v2160_v49 = vld [vmem:[#allocation6 + $0x170] sm:$0xff] }
 0x88f   :  { %3021 = vmatpush1.bf16.msra.mxu0 %v3020_v5  ;;  %3053 = vmatpush1.bf16.msra.mxu1 %v3052_v31  ;;  %v3070_v5 = vpack.c.bf16 %v2161_v15, %v2157_v48  ;;  %v2156_v31 = vld [vmem:[#allocation6 + $0x150] sm:$0xff] }
 0x890   :  { %3023 = vmatprep.subr.bf16.mxu0 %v3022_v1  ;;  %3055 = vmatprep.subr.bf16.mxu1 %v3054_v14  ;;  %v2167_v1 = vld [vmem:[#allocation6 + $0x1a8] sm:$0xff]  ;;  %v3072_v52 = vpack.c.bf16 %v2160_v49, %v2156_v31  ;;  %v2169_v14 = vld [vmem:[#allocation6 + $0x1b8] sm:$0xff] }
 0x891   :  { %v3042_v59 = vpack.c.bf16 %v2167_v1, %v2163_v43  ;;  %v3074_v36 = vpack.c.bf16 %v2169_v14, %v2165_v9 }
 0x893   :  { %3025 = vmatpush1.bf16.msra.mxu0 %v3024_v27  ;;  %3057 = vmatpush1.bf16.msra.mxu1 %v3056_v40  ;;  %v2162_v27 = vld [vmem:[#allocation6 + $0x180] sm:$0xff]  ;;  %v2164_v40 = vld [vmem:[#allocation6 + $0x190] sm:$0xff] }
 0x894   :  { %3027 = vmatprep.subr.bf16.mxu0 %v3026_v17  ;;  %3059 = vmatprep.subr.bf16.mxu1 %v3058_v51  ;;  %v2173_v17 = vld [vmem:[#allocation6 + $0x1d8] sm:$0xff]  ;;  %v3044_v22 = vpack.c.bf16 %v2166_v12, %v2162_v27  ;;  %v3076_v42 = vpack.c.bf16 %v2168_v50, %v2164_v40  ;;  %v3046_v51 = vpack.c.bf16 %v2175_v58, %v2171_v53 }
 0x895   :  { %v3078_v18 = vpack.c.bf16 %v2177_v30, %v2173_v17 }
 0x897   :  { %3029 = vmatpush1.bf16.msra.mxu0 %v3028_v16  ;;  %3061 = vmatpush1.bf16.msra.mxu1 %v3060_v28  ;;  %v2170_v16 = vld [vmem:[#allocation6 + $0x1c0] sm:$0xff]  ;;  %v2172_v28 = vld [vmem:[#allocation6 + $0x1d0] sm:$0xff] }
 0x898   :  { %3031 = vmatprep.subr.bf16.mxu0 %v3030_v3  ;;  %3063 = vmatprep.subr.bf16.mxu1 %v3062_v63  ;;  %v3048_v41 = vpack.c.bf16 %v2174_v57, %v2170_v16  ;;  %v3080_v54 = vpack.c.bf16 %v2176_v35, %v2172_v28 }
 0x89b   :  { %3033 = vmatpush1.bf16.msra.mxu0 %v3032_v4  ;;  %3065 = vmatpush1.bf16.msra.mxu1 %v3064_v39 }
 0x89c   :  { %3035 = vmatprep.subr.bf16.mxu0 %v3034_v23  ;;  %3067 = vmatprep.subr.bf16.mxu1 %v3066_v32 }
 0x89f   :  { %3037 = vmatpush1.bf16.msra.mxu0 %v3036_v6  ;;  %3069 = vmatpush1.bf16.msra.mxu1 %v3068_v47 }
 0x8a0   :  { %3039 = vmatprep.subr.bf16.mxu0 %v3038_v7  ;;  %3071 = vmatprep.subr.bf16.mxu1 %v3070_v5 }
 0x8a3   :  { %3041 = vmatpush1.bf16.msra.mxu0 %v3040_v33  ;;  %3073 = vmatpush1.bf16.msra.mxu1 %v3072_v52 }
 0x8a4   :  { %3043 = vmatprep.subr.bf16.mxu0 %v3042_v59  ;;  %3075 = vmatprep.subr.bf16.mxu1 %v3074_v36 }
 0x8a7   :  { %3045 = vmatpush1.bf16.msra.mxu0 %v3044_v22  ;;  %3077 = vmatpush1.bf16.msra.mxu1 %v3076_v42 }
 0x8a8   :  { %3047 = vmatprep.subr.bf16.mxu0 %v3046_v51  ;;  %3079 = vmatprep.subr.bf16.mxu1 %v3078_v18 }
 0x8ab   :  { %3049 = vmatpush1.bf16.msra.mxu0 %v3048_v41  ;;  %3081 = vmatpush1.bf16.msra.mxu1 %v3080_v54 }
 0x960   :  { %v2001_v3 = vpop.f32.mrb[16].mxu0  ;;  %v2072_v8 = vpop.f32.mrb[16].mxu1 }
 0x961   :  { %v2002_v21 = vadd.f32 %v2001_v3, %v3527_v61  ;;  %v2073_v38 = vadd.f32 %v2072_v8, %v3525_v60  ;;  %v2003_v63 = vpop.f32.mrb[17].mxu0  ;;  %v2074_v4 = vpop.f32.mrb[17].mxu1 }
 0x962   :  { %v2004_v10 = vadd.f32 %v2003_v63, %v3529_v62  ;;  %v2075_v56 = vadd.f32 %v2074_v4, %v3534_v25 }
 0x963   :  { %v2429_v24 = vmul.f32 -1.442695, %v2002_v21  ;;  %v2431_v39 = vmul.f32 -1.442695, %v2073_v38  ;;  %v2439_v38 = vld [vmem:[%s3939_s3] ss:$0 sm:$0xff] }
 0x964   :  { %v2430_v44 = vmul.f32 -1.442695, %v2004_v10  ;;  %v2432_v45 = vmul.f32 -1.442695, %v2075_v56  ;;  %v2440_v10 = vld [vmem:[#allocation3] ss:$0 sm:$0xff] }
 0x965   :  { %3231 = vpow2.f32 %v2429_v24 }
 0x966   :  { %3233 = vpow2.f32 %v2431_v39 }
 0x967   :  { %3235 = vpow2.f32 %v2430_v44 }
 0x96f   :  { %v3232_v19 = vpop.eup %3231 }
 0x970   :  { %v3234_v23 = vpop.eup %3233  ;;  %v2089_v6 = vadd.f32 1.0, %v3232_v19 }
 0x971   :  { %v3236_v0 = vpop.eup %3235  ;;  %v2091_v2 = vadd.f32 1.0, %v3234_v23 }
 0x972   :  { %v2090_v32 = vadd.f32 1.0, %v3236_v0 }
 0x973   :  { %3237 = vrcp.f32 %v2091_v2 }
 0x974   :  { %3239 = vpow2.f32 %v2432_v45 }
 0x975   :  { %3241 = vrcp.f32 %v2090_v32 }
 0x976   :  { %3243 = vrcp.f32 %v2089_v6 }
 0x97d   :  { %v3238_v20 = vpop.eup %3237 }
 0x97e   :  { %v3240_v26 = vpop.eup %3239  ;;  %v2101_v37 = vmul.f32 2.0, %v3238_v20 }
 0x97f   :  { %v3242_v47 = vpop.eup %3241  ;;  %v2092_v7 = vadd.f32 1.0, %v3240_v26 }
 0x980   :  { %v2433_v11 = vadd.f32 -1.0, %v2101_v37  ;;  %v3244_v48 = vpop.eup %3243  ;;  %v2103_v5 = vmul.f32 %v3242_v47, %v3907_v34 }
 0x981   :  { %3245 = vrcp.f32 %v2092_v7 }
 0x982   :  { %v2104_v15 = vmul.f32 %v3244_v48, %v2433_v11 }
 0x984   :  { %v2105_v13 = vadd.f32 %v2104_v15, %v2103_v5 }
 0x986   :  { %v2109_v29 = vsel %vm2106_vm5, %v2105_v13, %v3907_v34 }
 0x987   :  { %3247 = vtanh.f32 %v2109_v29 }
 0x98b   :  { %v3246_v31 = vpop.eup %3245 }
 0x991   :  { %v3248_v33 = vpop.eup %3247 }
 0x992   :  { %v2111_v49 = vmul.f32 %v3248_v33, %v3246_v31 }
 0x994   :  { %v2112_v43 = vsel %vm2106_vm5, %v2111_v49, %v3910_v55 }
 0x995   :  { %2113 = vst [vmem:[#allocation2 + $0x6] sm:$0x1] %v2112_v43  ;;  %2243 = vmatmul.mubr.f32.vlgmr.msra.gmra.mrb[18].mxu0 %v2112_v43  ;;  %2314 = vmatmul.mubr.f32.vlgmr.msra.gmra.mrb[18].mxu1 %v2112_v43 }
 0xa68   :  { %v2244_v1 = vpop.f32.mrb[18].mxu0  ;;  %v2315_v52 = vpop.f32.mrb[18].mxu1 }
 0xa69   :  { %v2245_v59 = vadd.f32 %v2244_v1, %v3527_v61  ;;  %v2316_v9 = vadd.f32 %v2315_v52, %v3525_v60  ;;  %v2246_v14 = vpop.f32.mrb[19].mxu0  ;;  %v2317_v27 = vpop.f32.mrb[19].mxu1 }
 0xa6a   :  { %v2247_v36 = vadd.f32 %v2246_v14, %v3529_v62  ;;  %v2318_v55 = vadd.f32 %v2317_v27, %v3534_v25 }
 0xa6b   :  { %v2434_v34 = vmul.f32 -1.442695, %v2245_v59  ;;  %v2436_v12 = vmul.f32 -1.442695, %v2316_v9 }
 0xa6c   :  { %v2435_v40 = vmul.f32 -1.442695, %v2247_v36  ;;  %v2437_v58 = vmul.f32 -1.442695, %v2318_v55 }
 0xa6d   :  { %3249 = vpow2.f32 %v2434_v34 }
 0xa6e   :  { %3251 = vpow2.f32 %v2436_v12 }
 0xa6f   :  { %3253 = vpow2.f32 %v2435_v40 }
 0xa77   :  { %v3250_v50 = vpop.eup %3249 }
 0xa78   :  { %v3252_v53 = vpop.eup %3251  ;;  %v2332_v30 = vadd.f32 1.0, %v3250_v50 }
 0xa79   :  { %v3254_v17 = vpop.eup %3253  ;;  %v2334_v22 = vadd.f32 1.0, %v3252_v53 }
 0xa7a   :  { %v2333_v61 = vadd.f32 1.0, %v3254_v17 }
 0xa7b   :  { %3255 = vrcp.f32 %v2334_v22 }
 0xa7c   :  { %3257 = vpow2.f32 %v2437_v58 }
 0xa7d   :  { %3259 = vrcp.f32 %v2333_v61 }
 0xa7e   :  { %3261 = vrcp.f32 %v2332_v30 }
 0xa85   :  { %v3256_v60 = vpop.eup %3255 }
 0xa86   :  { %v3258_v62 = vpop.eup %3257  ;;  %v2344_v42 = vmul.f32 2.0, %v3256_v60 }
 0xa87   :  { %v3260_v51 = vpop.eup %3259  ;;  %v2335_v25 = vadd.f32 1.0, %v3258_v62 }
 0xa88   :  { %v2438_v16 = vadd.f32 -1.0, %v2344_v42  ;;  %v3262_v57 = vpop.eup %3261  ;;  %v2346_v28 = vmul.f32 %v3260_v51, %v2109_v29 }
 0xa89   :  { %3263 = vrcp.f32 %v2335_v25 }
 0xa8a   :  { %v2347_v18 = vmul.f32 %v3262_v57, %v2438_v16 }
 0xa8c   :  { %v2348_v35 = vadd.f32 %v2347_v18, %v2346_v28 }
 0xa8e   :  { %v2351_v41 = vsel %vm2349_vm6, %v2348_v35, %v2109_v29 }
 0xa8f   :  { %3265 = vtanh.f32 %v2351_v41 }
 0xa93   :  { %v3264_v54 = vpop.eup %3263 }
 0xa99   :  { %v3266_v3 = vpop.eup %3265 }
 0xa9a   :  { %v2353_v8 = vmul.f32 %v3266_v3, %v3264_v54 }
 0xa9c   :  { %v2354_v21 = vsel %vm2349_vm6, %v2353_v8, %v2112_v43 }
 0xa9d   :  { %2355 = vst [vmem:[#allocation2 + $0x7] sm:$0x1] %v2354_v21 }
 0xaa4   :  { %v2356_v63 = vld [vmem:[#allocation2] sm:$0xff] }
 0xaa5   :  { %v2364_v4 = vmul.f32 %v2439_v38, %v2356_v63 }
 0xaa7   :  { %2365 = vadd.xlane.f32.xlu0 %v2364_v4 }
 0xb34   :  { %v2366_v24 = vpop.xlane.xlu0 %2365 }
 0xb35   :  { %v2374_v39 = vadd.f32 %v2440_v10, %v2366_v24 }
 0xb37   :  { %v2441_v46 = vmul.f32 -1.442695, %v2374_v39 }
 0xb39   :  { %3267 = vpow2.f32 %v2441_v46 }
 0xb43   :  { %v3268_v44 = vpop.eup %3267 }
 0xb44   :  { %v2378_v56 = vadd.f32 1.0, %v3268_v44 }
 0xb46   :  { %3269 = vrcp.f32 %v2378_v56 }
 0xb50   :  { %v3270_v19 = vpop.eup %3269 }
 0xb51   :  { %2382 = vst.msk [vmem:[%s3941_s5] sm:$0xff] %vm2381_vm7, %v3270_v19 }
 0xb52   :  { %2387 = vsyncpa [#allocation5], 1 }
 0xb53   :  { %2388 = vsyncpa [#allocation7], 1 }

</bundles_post_ra>
